<compile_context>
chip_gen: v6e
topology: v6e:2x2x1
jax: 0.10.0
libtpu: 0.0.40
codegen_flags: <defaults>
</compile_context>

<pallas_src>
import math

import jax
import jax.numpy as jnp
from jax.experimental import pallas as pl
from jax.experimental.pallas import tpu as pltpu

DIMS = 16
NUM_CLASSES = 3
BATCH = 8

_EXPM_SQUARINGS = 4                       # scale by 2**-4, square 4 times
_INV_FACT = [1.0 / math.factorial(k) for k in range(13)]


def _vmem_spec():
    # Whole-array, resident in VMEM, no grid / index_map.
    return pl.BlockSpec(memory_space=pltpu.MemorySpace.VMEM)


def _mm(a, b):
    # Full f32 MXU precision.  Only used in the (rare, W-only) mask kernel and
    # for the single tiny M matmul, so the extra passes are effectively free.
    return jnp.dot(a, b, preferred_element_type=jnp.float32,
                   precision=jax.lax.Precision.HIGHEST)


def _eye(n):
    return (jax.lax.broadcasted_iota(jnp.int32, (n, n), 0) ==
            jax.lax.broadcasted_iota(jnp.int32, (n, n), 1)).astype(jnp.float32)


# --------------------------------------------------------------------------
# Kernel 1: mask = expm(W*W)[:dims, -1]   (W-only; run once per weight update)
# --------------------------------------------------------------------------
def notears_mask_kernel(wt_ref, mask_ref):
    d = mask_ref.shape[1]
    wt = wt_ref[...]                       # (d+1, d+1) = W.T
    a = wt * wt                            # (W*W).T

    c = _INV_FACT
    eye = _eye(a.shape[0])
    b = a * (1.0 / float(2 ** _EXPM_SQUARINGS))

    # Paterson-Stockmeyer order-12 Taylor of S = expm(b) - I (5 matmuls).
    b2 = _mm(b, b)
    b3 = _mm(b2, b)
    b4 = _mm(b2, b2)
    q0 = c[1] * b + c[2] * b2 + c[3] * b3
    q1 = c[4] * eye + c[5] * b + c[6] * b2 + c[7] * b3
    q2 = c[8] * eye + c[9] * b + c[10] * b2 + c[11] * b3
    s = c[12] * b4 + q2
    s = _mm(s, b4) + q1                    # Horner in b4
    s = _mm(s, b4) + q0

    # Squarings: exp(2B) - I = S @ S + 2S  (keeps "1 + tiny" off the MXU).
    for _ in range(_EXPM_SQUARINGS - 1):
        s = _mm(s, s) + 2.0 * s

    # Final squaring: only row d of the result is needed -> (1, d+1) matmul.
    row = _mm(s[d:d + 1, :], s) + 2.0 * s[d:d + 1, :]

    # expm((W*W).T)[d, :d] == expm(W*W)[:d, -1]; identity adds nothing
    # off-diagonal, so the mask is just the row of S.
    mask_ref[...] = row[:, 0:d]


# --------------------------------------------------------------------------
# Kernel 2: per-batch hot path:  M = [x|y] @ W ,  masked = x * mask
# --------------------------------------------------------------------------
def notears_forward_kernel(x_aug_ref, w_ref, mask_ref, out_ref):
    d = mask_ref.shape[1]
    x_aug = x_aug_ref[...]                                   # (B, d+1)
    m_full = _mm(x_aug, w_ref[...])                          # single MXU matmul
    out_ref[:, 0:d] = m_full[:, 0:d]                         # merged (B, 2d) output
    out_ref[:, d:2 * d] = x_aug[:, 0:d] * mask_ref[...]      # VPU broadcast mul


# --------------------------------------------------------------------------
# Kernel 3: y=None path / mask_feature(): masked = x * mask
# --------------------------------------------------------------------------
def notears_mask_feature_kernel(x_ref, mask_ref, out_ref):
    out_ref[...] = x_ref[...] * mask_ref[...]


# --------------------------------------------------------------------------
# Wrappers
# --------------------------------------------------------------------------
@jax.jit
def notears_mask(weight_pos, weight_neg):
    """expm(W*W)[:dims, -1] as a (1, dims) row.  Recompute after weight updates."""
    w = (weight_pos - weight_neg).astype(jnp.float32)
    d = w.shape[0] - 1
    wt = w.T                                # wrapper-side transpose: mask column
    return pl.pallas_call(                  # becomes a lane-dense row in-kernel
        notears_mask_kernel,
        out_shape=jax.ShapeDtypeStruct((1, d), jnp.float32),
        in_specs=[_vmem_spec()],
        out_specs=_vmem_spec(),
    )(wt)


@jax.jit
def _notears_forward_impl(x, y, weight_pos, weight_neg, mask):
    bsz, d = x.shape
    w = (weight_pos - weight_neg).astype(jnp.float32)
    x_aug = jnp.concatenate(
        [x.astype(jnp.float32), y.astype(jnp.float32).reshape(bsz, 1)], axis=1)
    out = pl.pallas_call(
        notears_forward_kernel,
        out_shape=jax.ShapeDtypeStruct((bsz, 2 * d), jnp.float32),
        in_specs=[_vmem_spec(), _vmem_spec(), _vmem_spec()],
        out_specs=_vmem_spec(),
    )(x_aug, w, mask)
    return out[:, :d], out[:, d:]


def notears_forward(x, y, weight_pos, weight_neg, mask=None):
    """Equivalent of NotearsClassifier.forward(x, y) -> (M[:, :dims], masked_x).

    Pass a cached `mask` (from notears_mask) to skip the expm entirely.
    """
    if mask is None:
        mask = notears_mask(weight_pos, weight_neg)
    return _notears_forward_impl(x, y, weight_pos, weight_neg, mask)


@jax.jit
def _notears_mask_feature_impl(x, mask):
    return pl.pallas_call(
        notears_mask_feature_kernel,
        out_shape=jax.ShapeDtypeStruct(x.shape, jnp.float32),
        in_specs=[_vmem_spec(), _vmem_spec()],
        out_specs=_vmem_spec(),
    )(x.astype(jnp.float32), mask)


def notears_forward_no_y(x, weight_pos, weight_neg, mask=None):
    """Equivalent of NotearsClassifier.forward(x) -> masked_x only.

    Reuses a cached mask instead of re-running the expm chain with y = 0.
    (The `.detach()` in the PyTorch code only affects autograd, not values.)
    """
    if mask is None:
        mask = notears_mask(weight_pos, weight_neg)
    return _notears_mask_feature_impl(x, mask)


if __name__ == "__main__":
    key = jax.random.PRNGKey(0)
    k1, k2, k3, k4 = jax.random.split(key, 4)
    dp1 = DIMS + 1

    # Deterministic synthetic parameters (module init shapes: (dims+1, dims+1)).
    # Mimic post-projection state: non-negative, zero diagonal.
    off_diag = 1.0 - jnp.eye(dp1, dtype=jnp.float32)
    weight_pos = 0.2 * jax.random.uniform(k1, (dp1, dp1), jnp.float32) * off_diag
    weight_neg = 0.2 * jax.random.uniform(k2, (dp1, dp1), jnp.float32) * off_diag

    x = jax.random.normal(k3, (BATCH, DIMS), jnp.float32)
    y = jax.random.randint(k4, (BATCH,), 0, NUM_CLASSES).astype(jnp.float32)

    # Mask (expm) computed once; reused by both forward variants.
    mask = notears_mask(weight_pos, weight_neg)
    jax.block_until_ready(mask)

    m, masked = notears_forward(x, y, weight_pos, weight_neg, mask=mask)
    jax.block_until_ready((m, masked))
    masked_only = notears_forward_no_y(x, weight_pos, weight_neg, mask=mask)
    jax.block_until_ready(masked_only)

    # Correctness check against a pure-JAX reference of the PyTorch math.
    with jax.default_matmul_precision("highest"):
        w_ref = weight_pos - weight_neg
        e_ref = jax.scipy.linalg.expm(w_ref * w_ref)
        x_aug_ref = jnp.concatenate([x, y[:, None]], axis=1)
        m_ref = (x_aug_ref @ w_ref)[:, :DIMS]
        mask_ref = e_ref[:DIMS, -1][None, :]
        masked_ref = x * mask_ref

    assert jnp.allclose(mask, mask_ref, atol=5e-3, rtol=1e-2)
    assert jnp.allclose(m, m_ref, atol=5e-3, rtol=1e-2)
    assert jnp.allclose(masked, masked_ref, atol=5e-3, rtol=1e-2)
    assert jnp.allclose(masked_only, masked_ref, atol=5e-3, rtol=1e-2)

    print("KERNEL_OK")
</pallas_src>

<mosaic_0001>
module attributes {stable_mosaic.version = 11 : i64} {
  func.func @notears_mask_kernel(%arg0: memref<17x17xf32, #tpu.memory_space<vmem>>, %arg1: memref<1x16xf32, #tpu.memory_space<vmem>>) attributes {dimension_semantics = [], scalar_prefetch = 0 : i64, scratch_operands = 0 : i64, tpu.core_type = #tpu.core_type<tc>} {
    %c0 = arith.constant 0 : index
    %c0_0 = arith.constant 0 : index
    %0 = vector.load %arg0[%c0, %c0_0] : memref<17x17xf32, #tpu.memory_space<vmem>>, vector<17x17xf32>
    %1 = arith.mulf %0, %0 : vector<17x17xf32>
    %2 = tpu.iota {dimensions = array<i32: 0>} : vector<17x17xi32>
    %3 = tpu.iota {dimensions = array<i32: 1>} : vector<17x17xi32>
    %4 = arith.cmpi eq, %2, %3 : vector<17x17xi32>
    %5 = arith.extui %4 : vector<17x17xi1> to vector<17x17xi32>
    %6 = arith.sitofp %5 : vector<17x17xi32> to vector<17x17xf32>
    %cst = arith.constant 6.250000e-02 : f32
    %7 = vector.broadcast %cst : f32 to vector<17x17xf32>
    %8 = arith.mulf %1, %7 : vector<17x17xf32>
    %cst_1 = arith.constant dense<0.000000e+00> : vector<17x17xf32>
    %9 = tpu.matmul %8, %8, %cst_1 {dimension_numbers = #tpu.dot_dimension_numbers<[1], [0], [0], [1], [0, 0, 1, 1], [], []>, precision = #tpu.contract_precision<fp32>} : vector<17x17xf32>, vector<17x17xf32>, vector<17x17xf32> -> vector<17x17xf32>
    %cst_2 = arith.constant dense<0.000000e+00> : vector<17x17xf32>
    %10 = tpu.matmul %9, %8, %cst_2 {dimension_numbers = #tpu.dot_dimension_numbers<[1], [0], [0], [1], [0, 0, 1, 1], [], []>, precision = #tpu.contract_precision<fp32>} : vector<17x17xf32>, vector<17x17xf32>, vector<17x17xf32> -> vector<17x17xf32>
    %cst_3 = arith.constant dense<0.000000e+00> : vector<17x17xf32>
    %11 = tpu.matmul %9, %9, %cst_3 {dimension_numbers = #tpu.dot_dimension_numbers<[1], [0], [0], [1], [0, 0, 1, 1], [], []>, precision = #tpu.contract_precision<fp32>} : vector<17x17xf32>, vector<17x17xf32>, vector<17x17xf32> -> vector<17x17xf32>
    %cst_4 = arith.constant 1.000000e+00 : f32
    %12 = vector.broadcast %cst_4 : f32 to vector<17x17xf32>
    %13 = arith.mulf %12, %8 : vector<17x17xf32>
    %cst_5 = arith.constant 5.000000e-01 : f32
    %14 = vector.broadcast %cst_5 : f32 to vector<17x17xf32>
    %15 = arith.mulf %14, %9 : vector<17x17xf32>
    %16 = arith.addf %13, %15 : vector<17x17xf32>
    %cst_6 = arith.constant 0.166666672 : f32
    %17 = vector.broadcast %cst_6 : f32 to vector<17x17xf32>
    %18 = arith.mulf %17, %10 : vector<17x17xf32>
    %19 = arith.addf %16, %18 : vector<17x17xf32>
    %cst_7 = arith.constant 0.0416666679 : f32
    %20 = vector.broadcast %cst_7 : f32 to vector<17x17xf32>
    %21 = arith.mulf %20, %6 : vector<17x17xf32>
    %cst_8 = arith.constant 0.00833333377 : f32
    %22 = vector.broadcast %cst_8 : f32 to vector<17x17xf32>
    %23 = arith.mulf %22, %8 : vector<17x17xf32>
    %24 = arith.addf %21, %23 : vector<17x17xf32>
    %cst_9 = arith.constant 0.00138888892 : f32
    %25 = vector.broadcast %cst_9 : f32 to vector<17x17xf32>
    %26 = arith.mulf %25, %9 : vector<17x17xf32>
    %27 = arith.addf %24, %26 : vector<17x17xf32>
    %cst_10 = arith.constant 1.98412701E-4 : f32
    %28 = vector.broadcast %cst_10 : f32 to vector<17x17xf32>
    %29 = arith.mulf %28, %10 : vector<17x17xf32>
    %30 = arith.addf %27, %29 : vector<17x17xf32>
    %cst_11 = arith.constant 2.48015876E-5 : f32
    %31 = vector.broadcast %cst_11 : f32 to vector<17x17xf32>
    %32 = arith.mulf %31, %6 : vector<17x17xf32>
    %cst_12 = arith.constant 2.75573188E-6 : f32
    %33 = vector.broadcast %cst_12 : f32 to vector<17x17xf32>
    %34 = arith.mulf %33, %8 : vector<17x17xf32>
    %35 = arith.addf %32, %34 : vector<17x17xf32>
    %cst_13 = arith.constant 2.755732E-7 : f32
    %36 = vector.broadcast %cst_13 : f32 to vector<17x17xf32>
    %37 = arith.mulf %36, %9 : vector<17x17xf32>
    %38 = arith.addf %35, %37 : vector<17x17xf32>
    %cst_14 = arith.constant 2.50521079E-8 : f32
    %39 = vector.broadcast %cst_14 : f32 to vector<17x17xf32>
    %40 = arith.mulf %39, %10 : vector<17x17xf32>
    %41 = arith.addf %38, %40 : vector<17x17xf32>
    %cst_15 = arith.constant 2.08767559E-9 : f32
    %42 = vector.broadcast %cst_15 : f32 to vector<17x17xf32>
    %43 = arith.mulf %42, %11 : vector<17x17xf32>
    %44 = arith.addf %43, %41 : vector<17x17xf32>
    %cst_16 = arith.constant dense<0.000000e+00> : vector<17x17xf32>
    %45 = tpu.matmul %44, %11, %cst_16 {dimension_numbers = #tpu.dot_dimension_numbers<[1], [0], [0], [1], [0, 0, 1, 1], [], []>, precision = #tpu.contract_precision<fp32>} : vector<17x17xf32>, vector<17x17xf32>, vector<17x17xf32> -> vector<17x17xf32>
    %46 = arith.addf %45, %30 : vector<17x17xf32>
    %cst_17 = arith.constant dense<0.000000e+00> : vector<17x17xf32>
    %47 = tpu.matmul %46, %11, %cst_17 {dimension_numbers = #tpu.dot_dimension_numbers<[1], [0], [0], [1], [0, 0, 1, 1], [], []>, precision = #tpu.contract_precision<fp32>} : vector<17x17xf32>, vector<17x17xf32>, vector<17x17xf32> -> vector<17x17xf32>
    %48 = arith.addf %47, %19 : vector<17x17xf32>
    %cst_18 = arith.constant dense<0.000000e+00> : vector<17x17xf32>
    %49 = tpu.matmul %48, %48, %cst_18 {dimension_numbers = #tpu.dot_dimension_numbers<[1], [0], [0], [1], [0, 0, 1, 1], [], []>, precision = #tpu.contract_precision<fp32>} : vector<17x17xf32>, vector<17x17xf32>, vector<17x17xf32> -> vector<17x17xf32>
    %cst_19 = arith.constant 2.000000e+00 : f32
    %50 = vector.broadcast %cst_19 : f32 to vector<17x17xf32>
    %51 = arith.mulf %50, %48 : vector<17x17xf32>
    %52 = arith.addf %49, %51 : vector<17x17xf32>
    %cst_20 = arith.constant dense<0.000000e+00> : vector<17x17xf32>
    %53 = tpu.matmul %52, %52, %cst_20 {dimension_numbers = #tpu.dot_dimension_numbers<[1], [0], [0], [1], [0, 0, 1, 1], [], []>, precision = #tpu.contract_precision<fp32>} : vector<17x17xf32>, vector<17x17xf32>, vector<17x17xf32> -> vector<17x17xf32>
    %cst_21 = arith.constant 2.000000e+00 : f32
    %54 = vector.broadcast %cst_21 : f32 to vector<17x17xf32>
    %55 = arith.mulf %54, %52 : vector<17x17xf32>
    %56 = arith.addf %53, %55 : vector<17x17xf32>
    %cst_22 = arith.constant dense<0.000000e+00> : vector<17x17xf32>
    %57 = tpu.matmul %56, %56, %cst_22 {dimension_numbers = #tpu.dot_dimension_numbers<[1], [0], [0], [1], [0, 0, 1, 1], [], []>, precision = #tpu.contract_precision<fp32>} : vector<17x17xf32>, vector<17x17xf32>, vector<17x17xf32> -> vector<17x17xf32>
    %cst_23 = arith.constant 2.000000e+00 : f32
    %58 = vector.broadcast %cst_23 : f32 to vector<17x17xf32>
    %59 = arith.mulf %58, %56 : vector<17x17xf32>
    %60 = arith.addf %57, %59 : vector<17x17xf32>
    %61 = vector.extract_strided_slice %60 {offsets = [16, 0], sizes = [1, 17], strides = [1, 1]} : vector<17x17xf32> to vector<1x17xf32>
    %cst_24 = arith.constant dense<0.000000e+00> : vector<1x17xf32>
    %62 = tpu.matmul %61, %60, %cst_24 {dimension_numbers = #tpu.dot_dimension_numbers<[1], [0], [0], [1], [0, 0, 1, 1], [], []>, precision = #tpu.contract_precision<fp32>} : vector<1x17xf32>, vector<17x17xf32>, vector<1x17xf32> -> vector<1x17xf32>
    %63 = vector.extract_strided_slice %60 {offsets = [16, 0], sizes = [1, 17], strides = [1, 1]} : vector<17x17xf32> to vector<1x17xf32>
    %cst_25 = arith.constant 2.000000e+00 : f32
    %64 = vector.broadcast %cst_25 : f32 to vector<1x17xf32>
    %65 = arith.mulf %64, %63 : vector<1x17xf32>
    %66 = arith.addf %62, %65 : vector<1x17xf32>
    %67 = vector.extract_strided_slice %66 {offsets = [0, 0], sizes = [1, 16], strides = [1, 1]} : vector<1x17xf32> to vector<1x16xf32>
    %c0_26 = arith.constant 0 : index
    %c0_27 = arith.constant 0 : index
    %68 = vector.load %arg1[%c0_26, %c0_27] : memref<1x16xf32, #tpu.memory_space<vmem>>, vector<1x16xf32>
    tpu.vector_store %arg1[%c0_26, %c0_27], %67 {strides = array<i32>} : memref<1x16xf32, #tpu.memory_space<vmem>>, vector<1x16xf32>,
    return
  }
}

</mosaic_0001>

<bundles_post_ra>
// kernel: notears_mask.1
= control target key start
LH: loop header
LB: loop body
LE: loop exit
PB: predicated region body
PF: predicated region fallthrough
CT: control target
= control target key end

     0   :  { %v6252_v3 = vmov 0.0   ;;  %s7470_s0 = inlined_call_operand.vmem [shape: f32[17,17], index: 0, kind: input, shape index: {}]   ;;  %s7471_s1 = inlined_call_operand.hbm [shape: f32[1,16], index: 1, kind: output, shape index: {}]  }
   0x1   :  { %v11_v0 = vld [vmem:[%s7470_s0 + $0x10] sm:$0x1]  ;;  %v10_v1 = vld [vmem:[%s7470_s0 + $0x8] sm:$0xff]  ;;  %v9_v2 = vld [vmem:[%s7470_s0] sm:$0xff]  ;;  %5453 = vmatprep.subr.mxu0 %v6252_v3  ;;  %5468 = vmatprep.subr.mxu1 %v6252_v3 }
   0x2   :  { %v14_v4 = vmul.f32 %v11_v0, %v11_v0  ;;  %v13_v5 = vmul.f32 %v10_v1, %v10_v1  ;;  %v12_v6 = vmul.f32 %v9_v2, %v9_v2 }
   0x3   :  { %6 = vsyncpa [#allocation3], 0  ;;  %vm43_vm0 = vcmask 1040384   ;;  %vm6253_vm1 = vmmov 0   ;;  %vm33_vm2 = vcmask 138240   ;;  %v15_v54 = vlaneseq  ;;  %s6254_s0 = smov [#allocation2]  }
   0x4   :  { %5459 = vmatprep.mubr.msk.f32.mxu0 %vm6253_vm1, %v6252_v3  ;;  %5474 = vmatprep.mubr.msk.f32.mxu1 %vm6253_vm1, %v6252_v3  ;;  %v6280_v7 = vmul.f32 0.0625, %v14_v4  ;;  %v6282_v8 = vmul.f32 0.0625, %v13_v5  ;;  %v6284_v9 = vmul.f32 0.0625, %v12_v6  ;;  %s5130_s12 = sshll.u32 %s6254_s0, 4  ;;  %vm5122_vm6 = vcmask 122880   ;;  %s5131_s12 = int_to_ptr.vmem [resolvable:$true] %s5130_s12 }
   0x5   :  { %v16_v59 = vshrl.u32 %v15_v54, 7  ;;  %v20_v60 = vand.u32 127, %v15_v54  ;;  %s6230_s13 = scalar_lea.vmem %s5131_s12, 16  ;;  %s6234_s14 = scalar_lea.vmem %s5131_s12, 32 }
   0x6   :  { %v44_v10 = vsel %vm43_vm0, %v6280_v7, 0  ;;  %v6289_v11 = vand.u32 4294901760, %v6282_v8  ;;  %v6292_v12 = vand.u32 4294901760, %v6284_v9  ;;  %v35_v13 = vsel %vm33_vm2, %v6284_v9, 0  ;;  %p6231_p0 = scmp.ne.s32.totalorder %s5131_s12, %s6230_s13  ;;  %p6235_p1 = scmp.lt.s32.totalorder %s5131_s12, %s5131_s12 }
   0x7   :  { %v6296_v14 = vand.u32 4294901760, %v44_v10  ;;  %v6298_v15 = vand.u32 4294901760, %v35_v13  ;;  %v38_v16 = vsel %vm33_vm2, %v6282_v8, 0  ;;  %v41_v17 = vsel %vm33_vm2, %v6280_v7, 0  ;;  %p6236_p2 = scmp.lt.s32.totalorder %s6234_s14, %s6230_s13 }
   0x8   :  { %v6306_v18 = vsub.f32 %v6282_v8, %v6289_v11  ;;  %v6308_v19 = vand.u32 4294901760, %v38_v16  ;;  %v6312_v20 = vsub.f32 %v6284_v9, %v6292_v12  ;;  %v6314_v21 = vand.u32 4294901760, %v41_v17 }
   0x9   :  { %5454 = vmatpush3.msra.mxu0 %v6296_v14  ;;  %v115_v22 = vsub.f32 %v35_v13, %v6298_v15  ;;  %v6319_v23 = vsub.f32 %v44_v10, %v6296_v14  ;;  %vm21_vm3 = vcmp.eq.s32.totalorder %v16_v59, %v20_v60  ;;  %v17_v4 = vadd.s32 8, %v16_v59  ;;  %p6237_p3 = por %p6236_p2, %p6235_p1 }
   0xa   :  { %5455 = vmatprep.subr.mxu0 %v6252_v3  ;;  %v6323_v24 = vand.u32 4294901760, %v6306_v18  ;;  %v6326_v25 = vsub.f32 %v38_v16, %v6308_v19  ;;  %v6329_v26 = vand.u32 4294901760, %v6312_v20  ;;  %v6332_v27 = vsub.f32 %v41_v17, %v6314_v21 }
   0xb   :  { %5456 = vmatpush3.msra.mxu0 %v6289_v11  ;;  %v116_v28 = vand.u32 4294901760, %v115_v22  ;;  %v6336_v29 = vand.u32 4294901760, %v6319_v23  ;;  %v6447_v10 = vsel %vm21_vm3, 1.0, %v6252_v3  ;;  %vm22_vm4 = vcmp.eq.s32.totalorder %v17_v4, %v20_v60  ;;  %p6238_p4 = pnand %p6237_p3, %p6231_p0 }
   0xc   :  { %5457 = vmatprep.subr.mxu0 %v6252_v3  ;;  %v181_v30 = vsub.f32 %v6306_v18, %v6323_v24  ;;  %v126_v31 = vand.u32 4294901760, %v6326_v25  ;;  %v188_v34 = vsub.f32 %v6312_v20, %v6329_v26  ;;  %v136_v35 = vand.u32 4294901760, %v6332_v27 }
   0xd   :  { %5458 = vmatpush3.msra.mxu0 %v6292_v12  ;;  %v117_v32 = vsub.f32 %v115_v22, %v116_v28  ;;  %v174_v33 = vsub.f32 %v6319_v23, %v6336_v29 }
   0xe   :  { %v127_v36 = vsub.f32 %v6326_v25, %v126_v31  ;;  %5483 = vmatprep.subr.mxu0 %v6252_v3  ;;  %v6352_v39 = vand.u32 4294901760, %v181_v30  ;;  %v6355_v41 = vand.u32 4294901760, %v188_v34  ;;  %v137_v42 = vsub.f32 %v6332_v27, %v136_v35 }
   0xf   :  { %v118_v37 = vand.u32 4294901760, %v117_v32  ;;  %v6350_v38 = vand.u32 4294901760, %v174_v33  ;;  %v6452_v34 = vsel %vm22_vm4, 1.0, %v6252_v3 }
  0x10   :  { %v128_v40 = vand.u32 4294901760, %v127_v36  ;;  %v138_v43 = vand.u32 4294901760, %v137_v42  ;;  %v1744_v42 = vmul.f32 0.041666668, %v6452_v34 }
  0x11   :  { %5460 = vmatmul.mubr.f32.vlgmr.msra.gmra.mxu0 %v118_v37  ;;  %5469 = vmatpush3.msra.mxu1 %v6350_v38 }
  0x12   :  { %5470 = vmatprep.subr.mxu1 %v6252_v3  ;;  %5462 = vmatprep.mubr.msk.f32.mxu0 %vm6253_vm1, %v6252_v3 }
  0x13   :  { %5471 = vmatpush3.msra.mxu1 %v6352_v39  ;;  %5484 = vmatpush3.msra.mxu0 %v6319_v23 }
  0x14   :  { %5472 = vmatprep.subr.mxu1 %v6252_v3  ;;  %5485 = vmatprep.subr.mxu0 %v6252_v3 }
  0x15   :  { %5463 = vmatmul.mubr.f32.gmra.mxu0 %v128_v40  ;;  %5473 = vmatpush3.msra.mxu1 %v6355_v41 }
  0x16   :  { %5475 = vmatmul.mubr.f32.vlgmr.msra.gmra.mxu1 %v6298_v15  ;;  %5465 = vmatprep.mubr.msk.f32.mxu0 %vm6253_vm1, %v6252_v3 }
  0x17   :  { %5477 = vmatprep.mubr.msk.f32.mxu1 %vm6253_vm1, %v6252_v3  ;;  %5486 = vmatpush3.msra.mxu0 %v6306_v18 }
  0x18   :  { %5487 = vmatprep.subr.mxu0 %v6252_v3  ;;  %5498 = vmatprep.subr.mxu1 %v6252_v3 }
  0x19   :  { %5466 = vmatmul.mubr.f32.gmra.mxu0 %v138_v43  ;;  %5499 = vmatpush3.msra.mxu1 %v6296_v14  ;;  %v1747_v43 = vmul.f32 0.008333334, %v6282_v8 }
  0x1a   :  { %5478 = vmatmul.mubr.f32.gmra.mxu1 %v6308_v19  ;;  %5488 = vmatpush3.msra.mxu0 %v6312_v20 }
  0x1b   :  { %5489 = vmatprep.mubr.msk.f32.mxu0 %vm6253_vm1, %v6252_v3  ;;  %5480 = vmatprep.mubr.msk.f32.mxu1 %vm6253_vm1, %v6252_v3 }
  0x1c   :  { %5500 = vmatprep.subr.mxu1 %v6252_v3  ;;  %5513 = vmatprep.subr.mxu0 %v6252_v3 }
  0x1d   :  { %5490 = vmatmul.mubr.f32.vlgmr.msra.gmra.mxu0 %v115_v22  ;;  %5501 = vmatpush3.msra.mxu1 %v6289_v11 }
  0x1e   :  { %5481 = vmatmul.mubr.f32.gmra.mxu1 %v6314_v21  ;;  %5492 = vmatprep.mubr.msk.f32.mxu0 %vm6253_vm1, %v6252_v3 }
  0x1f   :  { %5502 = vmatprep.subr.mxu1 %v6252_v3  ;;  %5504 = vmatprep.mubr.msk.f32.mxu1 %vm6253_vm1, %v6252_v3 }
  0x20   :  { %5503 = vmatpush3.msra.mxu1 %v6292_v12  ;;  %5514 = vmatpush3.msra.mxu0 %v6336_v29 }
  0x21   :  { %5493 = vmatmul.mubr.f32.gmra.mxu0 %v6326_v25  ;;  %5515 = vmatprep.subr.mxu0 %v6252_v3 }
  0x22   :  { %5505 = vmatmul.mubr.f32.vlgmr.msra.gmra.mxu1 %v116_v28  ;;  %5495 = vmatprep.mubr.msk.f32.mxu0 %vm6253_vm1, %v6252_v3  ;;  %v18_v28 = vadd.s32 16, %v16_v59 }
  0x23   :  { %5507 = vmatprep.mubr.msk.f32.mxu1 %vm6253_vm1, %v6252_v3  ;;  %5516 = vmatpush3.msra.mxu0 %v6323_v24 }
  0x24   :  { %5517 = vmatprep.subr.mxu0 %v6252_v3  ;;  %5528 = vmatprep.subr.mxu1 %v6252_v3  ;;  %vm23_vm5 = vcmp.eq.s32.totalorder %v18_v28, %v20_v60 }
  0x25   :  { %5496 = vmatmul.mubr.f32.gmra.mxu0 %v6332_v27  ;;  %5529 = vmatpush3.msra.mxu1 %v6296_v14 }
  0x26   :  { %5508 = vmatmul.mubr.f32.gmra.mxu1 %v126_v31  ;;  %5518 = vmatpush3.msra.mxu0 %v6329_v26 }
  0x27   :  { %5519 = vmatprep.mubr.msk.f32.mxu0 %vm6253_vm1, %v6252_v3  ;;  %5510 = vmatprep.mubr.msk.f32.mxu1 %vm6253_vm1, %v6252_v3 }
  0x28   :  { %5530 = vmatprep.subr.mxu1 %v6252_v3  ;;  %5543 = vmatprep.subr.mxu0 %v6252_v3 }
  0x29   :  { %5520 = vmatmul.mubr.f32.vlgmr.msra.gmra.mxu0 %v6298_v15  ;;  %5531 = vmatpush3.msra.mxu1 %v6289_v11 }
  0x2a   :  { %5511 = vmatmul.mubr.f32.gmra.mxu1 %v136_v35  ;;  %5522 = vmatprep.mubr.msk.f32.mxu0 %vm6253_vm1, %v6252_v3 }
  0x2b   :  { %5532 = vmatprep.subr.mxu1 %v6252_v3  ;;  %5534 = vmatprep.mubr.msk.f32.mxu1 %vm6253_vm1, %v6252_v3 }
  0x2c   :  { %5533 = vmatpush3.msra.mxu1 %v6292_v12  ;;  %5544 = vmatpush3.msra.mxu0 %v6296_v14 }
  0x2d   :  { %5523 = vmatmul.mubr.f32.gmra.mxu0 %v6308_v19  ;;  %5558 = vmatprep.subr.mxu1 %v6252_v3 }
  0x2e   :  { %5535 = vmatmul.mubr.f32.vlgmr.msra.gmra.mxu1 %v6298_v15  ;;  %5525 = vmatprep.mubr.msk.f32.mxu0 %vm6253_vm1, %v6252_v3 }
  0x2f   :  { %5537 = vmatprep.mubr.msk.f32.mxu1 %vm6253_vm1, %v6252_v3  ;;  %5559 = vmatpush3.msra.mxu1 %v6350_v38 }
  0x30   :  { %5560 = vmatprep.subr.mxu1 %v6252_v3  ;;  %5545 = vmatprep.subr.mxu0 %v6252_v3 }
  0x31   :  { %5526 = vmatmul.mubr.f32.gmra.mxu0 %v6314_v21  ;;  %5561 = vmatpush3.msra.mxu1 %v6352_v39 }
  0x32   :  { %5538 = vmatmul.mubr.f32.gmra.mxu1 %v6308_v19  ;;  %5562 = vmatprep.subr.mxu1 %v6252_v3  ;;  %v1743_v19 = vmul.f32 0.041666668, %v6447_v10 }
  0x33   :  { %5540 = vmatprep.mubr.msk.f32.mxu1 %vm6253_vm1, %v6252_v3  ;;  %5563 = vmatpush3.msra.mxu1 %v6355_v41 }
  0x34   :  { %5546 = vmatpush3.msra.mxu0 %v6289_v11  ;;  %5588 = vmatprep.subr.mxu1 %v6252_v3 }
  0x35   :  { %5547 = vmatprep.subr.mxu0 %v6252_v3  ;;  %5549 = vmatprep.mubr.msk.f32.mxu0 %vm6253_vm1, %v6252_v3 }
  0x36   :  { %5541 = vmatmul.mubr.f32.gmra.mxu1 %v6314_v21  ;;  %5548 = vmatpush3.msra.mxu0 %v6292_v12  ;;  %v1746_v21 = vmul.f32 0.008333334, %v6284_v9 }
  0x37   :  { %5564 = vmatprep.mubr.msk.f32.mxu1 %vm6253_vm1, %v6252_v3  ;;  %5573 = vmatprep.subr.mxu0 %v6252_v3 }
  0x38   :  { %v1749_v36 = vadd.f32 %v1746_v21, %v1743_v19 }
  0xd1   :  { %v120_v44 = vpop.f32.mrf.mxu0 }
  0xd3   :  { %v5461_v45 = vpop.f32.mrf.mxu0 }
  0xd5   :  { %v130_v46 = vpop.f32.mrf.mxu0 }
  0xd6   :  { %v226_v47 = vpop.f32.mrf.mxu1 }
  0xd7   :  { %v5464_v48 = vpop.f32.mrf.mxu0  ;;  %v227_v5 = vadd.f32 %v226_v47, %v120_v44 }
  0xd8   :  { %v5476_v49 = vpop.f32.mrf.mxu1 }
  0xd9   :  { %v140_v50 = vpop.f32.mrf.mxu0 }
  0xda   :  { %v232_v51 = vpop.f32.mrf.mxu1 }
  0xdb   :  { %v5467_v52 = vpop.f32.mrf.mxu0  ;;  %v233_v22 = vadd.f32 %v232_v51, %v130_v46  ;;  %v6464_v51 = vsel %vm23_vm5, 1.0, %v6252_v3 }
  0xdc   :  { %v5479_v53 = vpop.f32.mrf.mxu1 }
  0xdd   :  { %v316_v55 = vpop.f32.mrf.mxu0 }
  0xde   :  { %v238_v56 = vpop.f32.mrf.mxu1  ;;  %v317_v15 = vadd.f32 %v316_v55, %v227_v5 }
  0xdf   :  { %v5491_v57 = vpop.f32.mrf.mxu0  ;;  %v239_v37 = vadd.f32 %v238_v56, %v140_v50 }
  0xe0   :  { %v5482_v58 = vpop.f32.mrf.mxu1 }
  0xe1   :  { %v323_v61 = vpop.f32.mrf.mxu0  ;;  %v1750_v58 = vadd.f32 %v1747_v43, %v1744_v42 }
  0xe2   :  { %v406_v62 = vpop.f32.mrf.mxu1  ;;  %v324_v31 = vadd.f32 %v323_v61, %v233_v22  ;;  %v1745_v61 = vmul.f32 0.041666668, %v6464_v51 }
  0xe3   :  { %v5494_v63 = vpop.f32.mrf.mxu0  ;;  %v407_v25 = vadd.f32 %v406_v62, %v317_v15  ;;  %v1748_v62 = vmul.f32 0.008333334, %v6280_v7 }
  0xe4   :  { %v5506_v0 = vpop.f32.mrf.mxu1 }
  0xe5   :  { %v330_v1 = vpop.f32.mrf.mxu0  ;;  %v1751_v19 = vadd.f32 %v1748_v62, %v1745_v61 }
  0xe6   :  { %v414_v2 = vpop.f32.mrf.mxu1  ;;  %v331_v44 = vadd.f32 %v330_v1, %v239_v37 }
  0xe7   :  { %v5497_v6 = vpop.f32.mrf.mxu0  ;;  %v415_v38 = vadd.f32 %v414_v2, %v324_v31 }
  0xe8   :  { %v5509_v13 = vpop.f32.mrf.mxu1 }
  0xe9   :  { %v502_v16 = vpop.f32.mrf.mxu0 }
  0xea   :  { %v422_v17 = vpop.f32.mrf.mxu1  ;;  %v503_v32 = vadd.f32 %v502_v16, %v407_v25 }
  0xeb   :  { %v5521_v27 = vpop.f32.mrf.mxu0  ;;  %v423_v52 = vadd.f32 %v422_v17, %v331_v44 }
  0xec   :  { %v5512_v30 = vpop.f32.mrf.mxu1 }
  0xed   :  { %v508_v33 = vpop.f32.mrf.mxu0 }
  0xee   :  { %v588_v35 = vpop.f32.mrf.mxu1  ;;  %v509_v45 = vadd.f32 %v508_v33, %v415_v38 }
  0xef   :  { %v6454_v39 = vadd.f32 %v588_v35, %v503_v32  ;;  %v5524_v40 = vpop.f32.mrf.mxu0 }
  0xf0   :  { %v5536_v41 = vpop.f32.mrf.mxu1 }
  0xf1   :  { %v605_v46 = vsel %vm33_vm2, %v6454_v39, 0  ;;  %v514_v47 = vpop.f32.mrf.mxu0  ;;  %v1752_v48 = vmul.f32 0.0013888889, %v6454_v39  ;;  %v6545_v38 = vand.u32 4294901760, %v6454_v39 }
  0xf2   :  { %v6461_v49 = vand.u32 4294901760, %v605_v46  ;;  %v594_v50 = vpop.f32.mrf.mxu1  ;;  %v515_v59 = vadd.f32 %v514_v47, %v423_v52 }
  0xf3   :  { %v6466_v53 = vadd.f32 %v594_v50, %v509_v45  ;;  %v5527_v54 = vpop.f32.mrf.mxu0  ;;  %v6468_v55 = vadd.f32 %v1752_v48, %v1749_v36  ;;  %v6570_v43 = vsub.f32 %v6454_v39, %v6545_v38 }
  0xf4   :  { %v6471_v56 = vsub.f32 %v605_v46, %v6461_v49  ;;  %v5539_v57 = vpop.f32.mrf.mxu1  ;;  %5565 = vmatmul.mubr.f32.vlgmr.msra.gmra.mxu1 %v6461_v49 }
  0xf5   :  { %v608_v60 = vsel %vm33_vm2, %v6466_v53, 0  ;;  %5567 = vmatprep.mubr.msk.f32.mxu1 %vm6253_vm1, %v6252_v3  ;;  %5589 = vmatpush3.msra.mxu1 %v6296_v14  ;;  %v1753_v2 = vmul.f32 0.0013888889, %v6466_v53  ;;  %v6526_v32 = vand.u32 4294901760, %v6466_v53 }
  0xf6   :  { %v6481_v63 = vand.u32 4294901760, %v608_v60  ;;  %v600_v0 = vpop.f32.mrf.mxu1  ;;  %v6484_v1 = vand.u32 4294901760, %v6471_v56  ;;  %5590 = vmatprep.subr.mxu1 %v6252_v3 }
  0xf7   :  { %v6488_v4 = vadd.f32 %v600_v0, %v515_v59  ;;  %5591 = vmatpush3.msra.mxu1 %v6289_v11  ;;  %v6498_v15 = vadd.f32 %v1753_v2, %v1750_v58 }
  0xf8   :  { %v5542_v5 = vpop.f32.mrf.mxu1  ;;  %5568 = vmatmul.mubr.f32.gmra.mxu1 %v6481_v63  ;;  %v684_v6 = vsub.f32 %v6471_v56, %v6484_v1  ;;  %5592 = vmatprep.subr.mxu1 %v6252_v3  ;;  %v6496_v13 = vsub.f32 %v608_v60, %v6481_v63 }
  0xf9   :  { %v611_v16 = vsel %vm33_vm2, %v6488_v4, 0  ;;  %v1171_v17 = vsel %vm43_vm0, %v6488_v4, 0  ;;  %5570 = vmatprep.mubr.msk.f32.mxu1 %vm6253_vm1, %v6252_v3  ;;  %5593 = vmatpush3.msra.mxu1 %v6292_v12  ;;  %v1754_v28 = vmul.f32 0.0013888889, %v6488_v4 }
  0xfa   :  { %v6507_v21 = vand.u32 4294901760, %v611_v16  ;;  %v6509_v22 = vand.u32 4294901760, %v684_v6  ;;  %v6512_v25 = vand.u32 4294901760, %v6496_v13  ;;  %5618 = vmatprep.subr.mxu1 %v6252_v3  ;;  %v6515_v27 = vand.u32 4294901760, %v1171_v17 }
  0xfb   :  { %v6532_v33 = vadd.f32 %v1754_v28, %v1751_v19 }
  0xfc   :  { %5550 = vmatmul.mubr.f32.vlgmr.msra.gmra.mxu0 %v6509_v22  ;;  %5571 = vmatmul.mubr.f32.gmra.mxu1 %v6507_v21  ;;  %v694_v30 = vsub.f32 %v6496_v13, %v6512_v25  ;;  %v6523_v31 = vsub.f32 %v611_v16, %v6507_v21  ;;  %v6542_v37 = vsub.f32 %v1171_v17, %v6515_v27 }
  0xfd   :  { %5552 = vmatprep.mubr.msk.f32.mxu0 %vm6253_vm1, %v6252_v3  ;;  %5594 = vmatprep.mubr.msk.f32.mxu1 %vm6253_vm1, %v6252_v3 }
  0xfe   :  { %v6534_v35 = vand.u32 4294901760, %v694_v30  ;;  %5574 = vmatpush3.msra.mxu0 %v6319_v23  ;;  %v6538_v36 = vand.u32 4294901760, %v6523_v31  ;;  %v6557_v23 = vsub.f32 %v6466_v53, %v6526_v32  ;;  %v1300_v42 = vand.u32 4294901760, %v6542_v37 }
  0xff   :  { %5575 = vmatprep.subr.mxu0 %v6252_v3 }
 0x100   :  { %5553 = vmatmul.mubr.f32.gmra.mxu0 %v6534_v35  ;;  %5595 = vmatmul.mubr.f32.vlgmr.msra.gmra.mxu1 %v6484_v1  ;;  %v704_v40 = vsub.f32 %v6523_v31, %v6538_v36 }
 0x101   :  { %5555 = vmatprep.mubr.msk.f32.mxu0 %vm6253_vm1, %v6252_v3  ;;  %5597 = vmatprep.mubr.msk.f32.mxu1 %vm6253_vm1, %v6252_v3 }
 0x102   :  { %v6559_v41 = vand.u32 4294901760, %v704_v40  ;;  %5576 = vmatpush3.msra.mxu0 %v6306_v18  ;;  %5619 = vmatpush3.msra.mxu1 %v6296_v14  ;;  %v1307_v14 = vand.u32 4294901760, %v6557_v23  ;;  %v1301_v18 = vsub.f32 %v6542_v37, %v1300_v42 }
 0x103   :  { %5577 = vmatprep.subr.mxu0 %v6252_v3  ;;  %5620 = vmatprep.subr.mxu1 %v6252_v3 }
 0x104   :  { %5556 = vmatmul.mubr.f32.gmra.mxu0 %v6559_v41  ;;  %5598 = vmatmul.mubr.f32.gmra.mxu1 %v6512_v25  ;;  %v1302_v44 = vand.u32 4294901760, %v1301_v18  ;;  %v1732_v18 = vmul.f32 0.5, %v6466_v53 }
 0x105   :  { %5578 = vmatpush3.msra.mxu0 %v6312_v20  ;;  %5579 = vmatprep.mubr.msk.f32.mxu0 %vm6253_vm1, %v6252_v3  ;;  %v1314_v20 = vand.u32 4294901760, %v6570_v43 }
 0x106   :  { %5600 = vmatprep.mubr.msk.f32.mxu1 %vm6253_vm1, %v6252_v3  ;;  %5621 = vmatpush3.msra.mxu1 %v6289_v11  ;;  %v1308_v11 = vsub.f32 %v6557_v23, %v1307_v14 }
 0x107   :  { %5622 = vmatprep.subr.mxu1 %v6252_v3  ;;  %5603 = vmatprep.subr.mxu0 %v6252_v3 }
 0x108   :  { %5580 = vmatmul.mubr.f32.vlgmr.msra.gmra.mxu0 %v6471_v56  ;;  %5601 = vmatmul.mubr.f32.gmra.mxu1 %v6538_v36  ;;  %v1309_v45 = vand.u32 4294901760, %v1308_v11 }
 0x109   :  { %5623 = vmatpush3.msra.mxu1 %v6292_v12  ;;  %5582 = vmatprep.mubr.msk.f32.mxu0 %vm6253_vm1, %v6252_v3  ;;  %v1315_v12 = vsub.f32 %v6570_v43, %v1314_v20 }
 0x10a   :  { %5624 = vmatprep.mubr.msk.f32.mxu1 %vm6253_vm1, %v6252_v3  ;;  %5648 = vmatprep.subr.mxu1 %v6252_v3 }
 0x10b   :  { %5604 = vmatpush3.msra.mxu0 %v6336_v29  ;;  %v1316_v29 = vand.u32 4294901760, %v1315_v12 }
 0x10c   :  { %5583 = vmatmul.mubr.f32.gmra.mxu0 %v6496_v13  ;;  %5625 = vmatmul.mubr.f32.vlgmr.msra.gmra.mxu1 %v6461_v49 }
 0x10d   :  { %5649 = vmatpush3.msra.mxu1 %v1302_v44  ;;  %5585 = vmatprep.mubr.msk.f32.mxu0 %vm6253_vm1, %v6252_v3 }
 0x10e   :  { %5650 = vmatprep.subr.mxu1 %v6252_v3  ;;  %5605 = vmatprep.subr.mxu0 %v6252_v3 }
 0x10f   :  { %5651 = vmatpush3.msra.mxu1 %v1309_v45  ;;  %5627 = vmatprep.mubr.msk.f32.mxu1 %vm6253_vm1, %v6252_v3 }
 0x110   :  { %5652 = vmatprep.subr.mxu1 %v6252_v3  ;;  %5586 = vmatmul.mubr.f32.gmra.mxu0 %v6523_v31 }
 0x111   :  { %5606 = vmatpush3.msra.mxu0 %v6323_v24  ;;  %5628 = vmatmul.mubr.f32.gmra.mxu1 %v6481_v63 }
 0x112   :  { %5653 = vmatpush3.msra.mxu1 %v1316_v29  ;;  %5607 = vmatprep.subr.mxu0 %v6252_v3 }
 0x113   :  { %5608 = vmatpush3.msra.mxu0 %v6329_v26  ;;  %5609 = vmatprep.mubr.msk.f32.mxu0 %vm6253_vm1, %v6252_v3 }
 0x114   :  { %5630 = vmatprep.mubr.msk.f32.mxu1 %vm6253_vm1, %v6252_v3  ;;  %5633 = vmatprep.subr.mxu0 %v6252_v3 }
 0x115   :  { %5610 = vmatmul.mubr.f32.vlgmr.msra.gmra.mxu0 %v6461_v49  ;;  %5631 = vmatmul.mubr.f32.gmra.mxu1 %v6507_v21 }
 0x116   :  { %5634 = vmatpush3.msra.mxu0 %v6515_v27  ;;  %5612 = vmatprep.mubr.msk.f32.mxu0 %vm6253_vm1, %v6252_v3 }
 0x117   :  { %5635 = vmatprep.subr.mxu0 %v6252_v3  ;;  %5654 = vmatprep.mubr.msk.f32.mxu1 %vm6253_vm1, %v6252_v3 }
 0x118   :  { %5636 = vmatpush3.msra.mxu0 %v6526_v32  ;;  %5678 = vmatprep.subr.mxu1 %v6252_v3 }
 0x119   :  { %5637 = vmatprep.subr.mxu0 %v6252_v3  ;;  %5613 = vmatmul.mubr.f32.gmra.mxu0 %v6481_v63 }
 0x11a   :  { %5638 = vmatpush3.msra.mxu0 %v6545_v38  ;;  %5655 = vmatmul.mubr.f32.vlgmr.msra.gmra.mxu1 %v6461_v49 }
 0x11b   :  { %5679 = vmatpush3.msra.mxu1 %v6515_v27  ;;  %5615 = vmatprep.mubr.msk.f32.mxu0 %vm6253_vm1, %v6252_v3 }
 0x11c   :  { %5680 = vmatprep.subr.mxu1 %v6252_v3  ;;  %5657 = vmatprep.mubr.msk.f32.mxu1 %vm6253_vm1, %v6252_v3 }
 0x11d   :  { %5681 = vmatpush3.msra.mxu1 %v6526_v32  ;;  %5616 = vmatmul.mubr.f32.gmra.mxu0 %v6507_v21 }
 0x11e   :  { %5682 = vmatprep.subr.mxu1 %v6252_v3  ;;  %5658 = vmatmul.mubr.f32.gmra.mxu1 %v6481_v63 }
 0x11f   :  { %5683 = vmatpush3.msra.mxu1 %v6545_v38  ;;  %5639 = vmatprep.mubr.msk.f32.mxu0 %vm6253_vm1, %v6252_v3 }
 0x120   :  { %5660 = vmatprep.mubr.msk.f32.mxu1 %vm6253_vm1, %v6252_v3  ;;  %5663 = vmatprep.subr.mxu0 %v6252_v3 }
 0x121   :  { %5640 = vmatmul.mubr.f32.vlgmr.msra.gmra.mxu0 %v6509_v22  ;;  %5708 = vmatprep.subr.mxu1 %v6252_v3 }
 0x122   :  { %5661 = vmatmul.mubr.f32.gmra.mxu1 %v6507_v21  ;;  %5664 = vmatpush3.msra.mxu0 %v6542_v37 }
 0x123   :  { %5665 = vmatprep.subr.mxu0 %v6252_v3  ;;  %5642 = vmatprep.mubr.msk.f32.mxu0 %vm6253_vm1, %v6252_v3 }
 0x124   :  { %5666 = vmatpush3.msra.mxu0 %v6557_v23  ;;  %5684 = vmatprep.mubr.msk.f32.mxu1 %vm6253_vm1, %v6252_v3 }
 0x125   :  { %5667 = vmatprep.subr.mxu0 %v6252_v3  ;;  %5643 = vmatmul.mubr.f32.gmra.mxu0 %v6534_v35 }
 0x126   :  { %5668 = vmatpush3.msra.mxu0 %v6570_v43  ;;  %5685 = vmatmul.mubr.f32.vlgmr.msra.gmra.mxu1 %v6484_v1 }
 0x127   :  { %5709 = vmatpush3.msra.mxu1 %v6515_v27  ;;  %5645 = vmatprep.mubr.msk.f32.mxu0 %vm6253_vm1, %v6252_v3 }
 0x128   :  { %5710 = vmatprep.subr.mxu1 %v6252_v3  ;;  %5687 = vmatprep.mubr.msk.f32.mxu1 %vm6253_vm1, %v6252_v3 }
 0x129   :  { %5711 = vmatpush3.msra.mxu1 %v6526_v32  ;;  %5646 = vmatmul.mubr.f32.gmra.mxu0 %v6559_v41 }
 0x12a   :  { %5712 = vmatprep.subr.mxu1 %v6252_v3  ;;  %5688 = vmatmul.mubr.f32.gmra.mxu1 %v6512_v25 }
 0x12b   :  { %5713 = vmatpush3.msra.mxu1 %v6545_v38  ;;  %5669 = vmatprep.mubr.msk.f32.mxu0 %vm6253_vm1, %v6252_v3  ;;  %v1731_v38 = vmul.f32 0.5, %v6454_v39 }
 0x12c   :  { %5690 = vmatprep.mubr.msk.f32.mxu1 %vm6253_vm1, %v6252_v3  ;;  %5693 = vmatprep.subr.mxu0 %v6252_v3 }
 0x12d   :  { %5670 = vmatmul.mubr.f32.vlgmr.msra.gmra.mxu0 %v6471_v56  ;;  %5738 = vmatprep.subr.mxu1 %v6252_v3  ;;  %v1734_v12 = vadd.f32 %v1731_v38, %v6284_v9 }
 0x12e   :  { %5691 = vmatmul.mubr.f32.gmra.mxu1 %v6538_v36  ;;  %5694 = vmatpush3.msra.mxu0 %v1300_v42 }
 0x12f   :  { %5695 = vmatprep.subr.mxu0 %v6252_v3  ;;  %5672 = vmatprep.mubr.msk.f32.mxu0 %vm6253_vm1, %v6252_v3 }
 0x130   :  { %5696 = vmatpush3.msra.mxu0 %v1307_v14  ;;  %5714 = vmatprep.mubr.msk.f32.mxu1 %vm6253_vm1, %v6252_v3 }
 0x131   :  { %5697 = vmatprep.subr.mxu0 %v6252_v3  ;;  %5673 = vmatmul.mubr.f32.gmra.mxu0 %v6496_v13 }
 0x132   :  { %5698 = vmatpush3.msra.mxu0 %v1314_v20  ;;  %5715 = vmatmul.mubr.f32.vlgmr.msra.gmra.mxu1 %v6461_v49 }
 0x133   :  { %5675 = vmatprep.mubr.msk.f32.mxu0 %vm6253_vm1, %v6252_v3  ;;  %5717 = vmatprep.mubr.msk.f32.mxu1 %vm6253_vm1, %v6252_v3 }
 0x134   :  { %5723 = vmatprep.subr.mxu0 %v6252_v3 }
 0x135   :  { %5676 = vmatmul.mubr.f32.gmra.mxu0 %v6523_v31 }
 0x136   :  { %5718 = vmatmul.mubr.f32.gmra.mxu1 %v6481_v63  ;;  %5699 = vmatprep.mubr.msk.f32.mxu0 %vm6253_vm1, %v6252_v3 }
 0x137   :  { %5720 = vmatprep.mubr.msk.f32.mxu1 %vm6253_vm1, %v6252_v3 }
 0x139   :  { %5700 = vmatmul.mubr.f32.vlgmr.msra.gmra.mxu0 %v6461_v49 }
 0x13a   :  { %5721 = vmatmul.mubr.f32.gmra.mxu1 %v6507_v21  ;;  %5702 = vmatprep.mubr.msk.f32.mxu0 %vm6253_vm1, %v6252_v3 }
 0x13b   :  { %5744 = vmatprep.mubr.msk.f32.mxu1 %vm6253_vm1, %v6252_v3 }
 0x13d   :  { %5703 = vmatmul.mubr.f32.gmra.mxu0 %v6481_v63 }
 0x13e   :  { %5705 = vmatprep.mubr.msk.f32.mxu0 %vm6253_vm1, %v6252_v3 }
 0x141   :  { %5706 = vmatmul.mubr.f32.gmra.mxu0 %v6507_v21 }
 0x142   :  { %5729 = vmatprep.mubr.msk.f32.mxu0 %vm6253_vm1, %v6252_v3 }
 0x1b4   :  { %v793_v24 = vpop.f32.mrf.mxu1 }
 0x1b6   :  { %v5566_v26 = vpop.f32.mrf.mxu1 }
 0x1b8   :  { %v799_v46 = vpop.f32.mrf.mxu1 }
 0x1ba   :  { %v5569_v47 = vpop.f32.mrf.mxu1 }
 0x1bc   :  { %v687_v48 = vpop.f32.mrf.mxu0  ;;  %v805_v49 = vpop.f32.mrf.mxu1 }
 0x1bd   :  { %v794_v13 = vadd.f32 %v793_v24, %v687_v48 }
 0x1be   :  { %v5551_v50 = vpop.f32.mrf.mxu0  ;;  %v5572_v52 = vpop.f32.mrf.mxu1 }
 0x1bf   :  { %v1735_v50 = vadd.f32 %v1732_v18, %v6282_v8 }
 0x1c0   :  { %v697_v54 = vpop.f32.mrf.mxu0  ;;  %v973_v56 = vpop.f32.mrf.mxu1 }
 0x1c1   :  { %v800_v25 = vadd.f32 %v799_v46, %v697_v54 }
 0x1c2   :  { %v5554_v57 = vpop.f32.mrf.mxu0  ;;  %v5596_v58 = vpop.f32.mrf.mxu1 }
 0x1c3   :  { %v1733_v58 = vmul.f32 0.5, %v6488_v4 }
 0x1c4   :  { %v707_v59 = vpop.f32.mrf.mxu0  ;;  %v981_v60 = vpop.f32.mrf.mxu1 }
 0x1c5   :  { %v806_v36 = vadd.f32 %v805_v49, %v707_v59 }
 0x1c6   :  { %v5557_v61 = vpop.f32.mrf.mxu0  ;;  %v5599_v62 = vpop.f32.mrf.mxu1 }
 0x1c8   :  { %v883_v63 = vpop.f32.mrf.mxu0  ;;  %v989_v0 = vpop.f32.mrf.mxu1 }
 0x1c9   :  { %v884_v19 = vadd.f32 %v883_v63, %v794_v13 }
 0x1ca   :  { %v5581_v1 = vpop.f32.mrf.mxu0  ;;  %v5602_v2 = vpop.f32.mrf.mxu1 }
 0x1cb   :  { %v974_v31 = vadd.f32 %v973_v56, %v884_v19  ;;  %v1736_v2 = vadd.f32 %v1733_v58, %v6280_v7 }
 0x1cc   :  { %v890_v5 = vpop.f32.mrf.mxu0  ;;  %v1155_v6 = vpop.f32.mrf.mxu1 }
 0x1cd   :  { %v891_v30 = vadd.f32 %v890_v5, %v800_v25 }
 0x1ce   :  { %v5584_v16 = vpop.f32.mrf.mxu0  ;;  %v5626_v17 = vpop.f32.mrf.mxu1 }
 0x1cf   :  { %v982_v43 = vadd.f32 %v981_v60, %v891_v30 }
 0x1d0   :  { %v897_v21 = vpop.f32.mrf.mxu0 }
 0x1d1   :  { %v1161_v22 = vpop.f32.mrf.mxu1  ;;  %v898_v41 = vadd.f32 %v897_v21, %v806_v36 }
 0x1d2   :  { %v5587_v27 = vpop.f32.mrf.mxu0 }
 0x1d3   :  { %v5629_v28 = vpop.f32.mrf.mxu1  ;;  %v990_v46 = vadd.f32 %v989_v0, %v898_v41  ;;  %v1767_v41 = vmul.f32 2.7557319e-06, %v6284_v9 }
 0x1d5   :  { %v1069_v32 = vpop.f32.mrf.mxu0  ;;  %v1167_v35 = vpop.f32.mrf.mxu1 }
 0x1d6   :  { %v1070_v37 = vadd.f32 %v1069_v32, %v974_v31 }
 0x1d7   :  { %v5611_v40 = vpop.f32.mrf.mxu0  ;;  %v5632_v23 = vpop.f32.mrf.mxu1 }
 0x1d8   :  { %v6720_v42 = vadd.f32 %v1155_v6, %v1070_v37 }
 0x1d9   :  { %v1075_v14 = vpop.f32.mrf.mxu0 }
 0x1da   :  { %v1076_v20 = vadd.f32 %v1075_v14, %v982_v43  ;;  %v1353_v11 = vpop.f32.mrf.mxu1  ;;  %v1758_v44 = vmul.f32 0.0001984127, %v6720_v42  ;;  %v1737_v45 = vmul.f32 0.16666667, %v6720_v42 }
 0x1db   :  { %v5614_v29 = vpop.f32.mrf.mxu0 }
 0x1dc   :  { %v6726_v24 = vadd.f32 %v1161_v22, %v1076_v20  ;;  %v5656_v26 = vpop.f32.mrf.mxu1  ;;  %v6729_v47 = vadd.f32 %v1758_v44, %v6468_v55  ;;  %v6731_v48 = vadd.f32 %v1737_v45, %v1734_v12  ;;  %v1765_v12 = vmul.f32 2.4801588e-05, %v6452_v34 }
 0x1dd   :  { %v1081_v49 = vpop.f32.mrf.mxu0  ;;  %v1768_v45 = vmul.f32 2.7557319e-06, %v6282_v8  ;;  %v1766_v34 = vmul.f32 2.4801588e-05, %v6464_v51  ;;  %v1769_v8 = vmul.f32 2.7557319e-06, %v6280_v7 }
 0x1de   :  { %v1082_v52 = vadd.f32 %v1081_v49, %v990_v46  ;;  %v1359_v54 = vpop.f32.mrf.mxu1  ;;  %v1759_v56 = vmul.f32 0.0001984127, %v6726_v24  ;;  %v1738_v57 = vmul.f32 0.16666667, %v6726_v24  ;;  %v1773_v46 = vmul.f32 2.755732e-07, %v6454_v39 }
 0x1df   :  { %v5617_v59 = vpop.f32.mrf.mxu0  ;;  %v1771_v58 = vadd.f32 %v1768_v45, %v1765_v12 }
 0x1e0   :  { %v6737_v60 = vadd.f32 %v1167_v35, %v1082_v52  ;;  %v5659_v61 = vpop.f32.mrf.mxu1  ;;  %v6740_v55 = vadd.f32 %v1759_v56, %v6498_v15  ;;  %v6742_v62 = vadd.f32 %v1738_v57, %v1735_v50 }
 0x1e1   :  { %v1247_v63 = vpop.f32.mrf.mxu0 }
 0x1e2   :  { %v1365_v0 = vpop.f32.mrf.mxu1  ;;  %v1760_v1 = vmul.f32 0.0001984127, %v6737_v60  ;;  %v1739_v5 = vmul.f32 0.16666667, %v6737_v60  ;;  %v1354_v38 = vadd.f32 %v1353_v11, %v1247_v63 }
 0x1e3   :  { %v5641_v6 = vpop.f32.mrf.mxu0 }
 0x1e4   :  { %v5662_v13 = vpop.f32.mrf.mxu1  ;;  %v6748_v16 = vadd.f32 %v1760_v1, %v6532_v33  ;;  %v6750_v17 = vadd.f32 %v1739_v5, %v1736_v2  ;;  %v1764_v33 = vmul.f32 2.4801588e-05, %v6447_v10  ;;  %v1779_v10 = vmul.f32 2.5052108e-08, %v6720_v42 }
 0x1e5   :  { %v1257_v19 = vpop.f32.mrf.mxu0  ;;  %v1780_v5 = vmul.f32 2.5052108e-08, %v6726_v24 }
 0x1e6   :  { %v1533_v15 = vpop.f32.mrf.mxu1  ;;  %v1360_v20 = vadd.f32 %v1359_v54, %v1257_v19  ;;  %v1770_v26 = vadd.f32 %v1767_v41, %v1764_v33  ;;  %v1774_v54 = vmul.f32 2.755732e-07, %v6466_v53  ;;  %v1775_v53 = vmul.f32 2.755732e-07, %v6488_v4 }
 0x1e7   :  { %v5644_v21 = vpop.f32.mrf.mxu0 }
 0x1e8   :  { %v5686_v22 = vpop.f32.mrf.mxu1  ;;  %v1776_v61 = vadd.f32 %v1773_v46, %v1770_v26  ;;  %v1777_v19 = vadd.f32 %v1774_v54, %v1771_v58  ;;  %v1772_v21 = vadd.f32 %v1769_v8, %v1766_v34 }
 0x1e9   :  { %v1267_v25 = vpop.f32.mrf.mxu0 }
 0x1ea   :  { %v1541_v27 = vpop.f32.mrf.mxu1  ;;  %v1366_v9 = vadd.f32 %v1365_v0, %v1267_v25  ;;  %v1782_v42 = vadd.f32 %v1779_v10, %v1776_v61  ;;  %v1783_v7 = vadd.f32 %v1780_v5, %v1777_v19 }
 0x1eb   :  { %v5647_v28 = vpop.f32.mrf.mxu0 }
 0x1ec   :  { %v5689_v30 = vpop.f32.mrf.mxu1  ;;  %v1781_v28 = vmul.f32 2.5052108e-08, %v6737_v60 }
 0x1ed   :  { %v1443_v31 = vpop.f32.mrf.mxu0 }
 0x1ee   :  { %v1549_v32 = vpop.f32.mrf.mxu1  ;;  %v1444_v43 = vadd.f32 %v1443_v31, %v1354_v38  ;;  %v1778_v38 = vadd.f32 %v1775_v53, %v1772_v21 }
 0x1ef   :  { %v5671_v35 = vpop.f32.mrf.mxu0 }
 0x1f0   :  { %v5692_v36 = vpop.f32.mrf.mxu1  ;;  %v1534_v50 = vadd.f32 %v1533_v15, %v1444_v43  ;;  %v1784_v33 = vadd.f32 %v1781_v28, %v1778_v38 }
 0x1f1   :  { %v1450_v37 = vpop.f32.mrf.mxu0 }
 0x1f2   :  { %v1715_v40 = vpop.f32.mrf.mxu1  ;;  %v1451_v11 = vadd.f32 %v1450_v37, %v1360_v20 }
 0x1f3   :  { %v5674_v23 = vpop.f32.mrf.mxu0 }
 0x1f4   :  { %v5716_v14 = vpop.f32.mrf.mxu1  ;;  %v1542_v2 = vadd.f32 %v1541_v27, %v1451_v11 }
 0x1f5   :  { %v1457_v18 = vpop.f32.mrf.mxu0 }
 0x1f6   :  { %v1721_v44 = vpop.f32.mrf.mxu1  ;;  %v1458_v63 = vadd.f32 %v1457_v18, %v1366_v9 }
 0x1f7   :  { %v5677_v29 = vpop.f32.mrf.mxu0 }
 0x1f8   :  { %v5719_v49 = vpop.f32.mrf.mxu1  ;;  %v1550_v25 = vadd.f32 %v1549_v32, %v1458_v63 }
 0x1f9   :  { %v1629_v52 = vpop.f32.mrf.mxu0 }
 0x1fa   :  { %v1630_v56 = vadd.f32 %v1629_v52, %v1534_v50  ;;  %v1727_v57 = vpop.f32.mrf.mxu1 }
 0x1fb   :  { %v5701_v59 = vpop.f32.mrf.mxu0 }
 0x1fc   :  { %v1716_v39 = vadd.f32 %v1715_v40, %v1630_v56  ;;  %v5722_v1 = vpop.f32.mrf.mxu1 }
 0x1fd   :  { %v1635_v6 = vpop.f32.mrf.mxu0 }
 0x1fe   :  { %v1785_v0 = vmul.f32 2.0876756e-09, %v1716_v39  ;;  %v1636_v13 = vadd.f32 %v1635_v6, %v1542_v2  ;;  %v6764_v30 = vand.u32 4294901760, %v1716_v39 }
 0x1ff   :  { %v5704_v15 = vpop.f32.mrf.mxu0 }
 0x200   :  { %v1788_v22 = vadd.f32 %v1785_v0, %v1782_v42  ;;  %v1722_v51 = vadd.f32 %v1721_v44, %v1636_v13  ;;  %v6778_v41 = vsub.f32 %v1716_v39, %v6764_v30 }
 0x201   :  { %v1641_v27 = vpop.f32.mrf.mxu0 }
 0x202   :  { %v1792_v24 = vsel %vm33_vm2, %v1788_v22, 0  ;;  %v1786_v31 = vmul.f32 2.0876756e-09, %v1722_v51  ;;  %v6767_v35 = vand.u32 4294901760, %v1722_v51  ;;  %v1642_v36 = vadd.f32 %v1641_v27, %v1550_v25 }
 0x203   :  { %v6769_v37 = vand.u32 4294901760, %v1792_v24  ;;  %v5707_v40 = vpop.f32.mrf.mxu0  ;;  %v6803_v50 = vand.u32 4294901760, %v6778_v41 }
 0x204   :  { %v1789_v4 = vadd.f32 %v1786_v31, %v1783_v7  ;;  %v1728_v23 = vadd.f32 %v1727_v57, %v1642_v36  ;;  %v6775_v60 = vsub.f32 %v1722_v51, %v6767_v35 }
 0x205   :  { %v6772_v32 = vsub.f32 %v1792_v24, %v6769_v37  ;;  %v1945_v61 = vsub.f32 %v6778_v41, %v6803_v50 }
 0x206   :  { %v1787_v43 = vmul.f32 2.0876756e-09, %v1728_v23  ;;  %v1801_v14 = vsel %vm43_vm0, %v1728_v23, 0  ;;  %v1795_v18 = vsel %vm33_vm2, %v1789_v4, 0  ;;  %v6798_v11 = vand.u32 4294901760, %v6775_v60 }
 0x207   :  { %v6782_v20 = vand.u32 4294901760, %v1801_v14  ;;  %v1873_v44 = vand.u32 4294901760, %v6772_v32  ;;  %v6785_v12 = vand.u32 4294901760, %v1795_v18  ;;  %v6842_v2 = vand.u32 4294901760, %v1945_v61 }
 0x208   :  { %v1790_v45 = vadd.f32 %v1787_v43, %v1784_v33  ;;  %v1938_v54 = vsub.f32 %v6775_v60, %v6798_v11 }
 0x209   :  { %v6788_v29 = vsub.f32 %v1801_v14, %v6782_v20  ;;  %5724 = vmatpush3.msra.mxu0 %v6782_v20  ;;  %v1874_v26 = vsub.f32 %v6772_v32, %v1873_v44  ;;  %v6795_v46 = vsub.f32 %v1795_v18, %v6785_v12 }
 0x20a   :  { %v1798_v49 = vsel %vm33_vm2, %v1790_v45, 0  ;;  %5725 = vmatprep.subr.mxu0 %v6252_v3  ;;  %v6836_v39 = vand.u32 4294901760, %v1938_v54 }
 0x20b   :  { %v6805_v52 = vand.u32 4294901760, %v1798_v49  ;;  %5726 = vmatpush3.msra.mxu0 %v6767_v35  ;;  %v1875_v10 = vand.u32 4294901760, %v1874_v26  ;;  %v6809_v9 = vand.u32 4294901760, %v6788_v29  ;;  %v1883_v56 = vand.u32 4294901760, %v6795_v46 }
 0x20c   :  { %5727 = vmatprep.subr.mxu0 %v6252_v3 }
 0x20d   :  { %5728 = vmatpush3.msra.mxu0 %v6764_v30  ;;  %v1931_v57 = vsub.f32 %v6788_v29, %v6809_v9  ;;  %v1884_v58 = vsub.f32 %v6795_v46, %v1883_v56  ;;  %v6822_v59 = vsub.f32 %v1798_v49, %v6805_v52 }
 0x20e   :  { %5730 = vmatmul.mubr.f32.vlgmr.msra.gmra.mxu0 %v1875_v10  ;;  %5753 = vmatprep.subr.mxu0 %v6252_v3 }
 0x20f   :  { %5754 = vmatpush3.msra.mxu0 %v6788_v29  ;;  %5732 = vmatprep.mubr.msk.f32.mxu0 %vm6253_vm1, %v6252_v3  ;;  %v6828_v34 = vand.u32 4294901760, %v1931_v57  ;;  %v1885_v8 = vand.u32 4294901760, %v1884_v58  ;;  %v1893_v63 = vand.u32 4294901760, %v6822_v59 }
 0x210   :  { %5755 = vmatprep.subr.mxu0 %v6252_v3 }
 0x211   :  { %5739 = vmatpush3.msra.mxu1 %v6828_v34  ;;  %5756 = vmatpush3.msra.mxu0 %v6775_v60  ;;  %v1894_v1 = vsub.f32 %v6822_v59, %v1893_v63 }
 0x212   :  { %5733 = vmatmul.mubr.f32.gmra.mxu0 %v1885_v8  ;;  %5740 = vmatprep.subr.mxu1 %v6252_v3 }
 0x213   :  { %5757 = vmatprep.subr.mxu0 %v6252_v3  ;;  %5741 = vmatpush3.msra.mxu1 %v6836_v39  ;;  %v1895_v5 = vand.u32 4294901760, %v1894_v1 }
 0x214   :  { %5758 = vmatpush3.msra.mxu0 %v6778_v41  ;;  %5742 = vmatprep.subr.mxu1 %v6252_v3 }
 0x215   :  { %5735 = vmatprep.mubr.msk.f32.mxu0 %vm6253_vm1, %v6252_v3  ;;  %5743 = vmatpush3.msra.mxu1 %v6842_v2 }
 0x216   :  { %5736 = vmatmul.mubr.f32.gmra.mxu0 %v1895_v5  ;;  %5745 = vmatmul.mubr.f32.vlgmr.msra.gmra.mxu1 %v6769_v37 }
 0x217   :  { %5768 = vmatprep.subr.mxu1 %v6252_v3  ;;  %5747 = vmatprep.mubr.msk.f32.mxu1 %vm6253_vm1, %v6252_v3 }
 0x218   :  { %5769 = vmatpush3.msra.mxu1 %v6782_v20  ;;  %5759 = vmatprep.mubr.msk.f32.mxu0 %vm6253_vm1, %v6252_v3 }
 0x219   :  { %5770 = vmatprep.subr.mxu1 %v6252_v3  ;;  %5783 = vmatprep.subr.mxu0 %v6252_v3 }
 0x21a   :  { %5771 = vmatpush3.msra.mxu1 %v6767_v35  ;;  %5760 = vmatmul.mubr.f32.vlgmr.msra.gmra.mxu0 %v6772_v32 }
 0x21b   :  { %5748 = vmatmul.mubr.f32.gmra.mxu1 %v6785_v12  ;;  %5772 = vmatprep.subr.mxu1 %v6252_v3 }
 0x21c   :  { %5784 = vmatpush3.msra.mxu0 %v6809_v9  ;;  %5773 = vmatpush3.msra.mxu1 %v6764_v30 }
 0x21d   :  { %5785 = vmatprep.subr.mxu0 %v6252_v3  ;;  %5750 = vmatprep.mubr.msk.f32.mxu1 %vm6253_vm1, %v6252_v3 }
 0x21e   :  { %5786 = vmatpush3.msra.mxu0 %v6798_v11  ;;  %5762 = vmatprep.mubr.msk.f32.mxu0 %vm6253_vm1, %v6252_v3 }
 0x21f   :  { %5787 = vmatprep.subr.mxu0 %v6252_v3  ;;  %5751 = vmatmul.mubr.f32.gmra.mxu1 %v6805_v52 }
 0x220   :  { %5763 = vmatmul.mubr.f32.gmra.mxu0 %v6795_v46  ;;  %5774 = vmatprep.mubr.msk.f32.mxu1 %vm6253_vm1, %v6252_v3 }
 0x221   :  { %5788 = vmatpush3.msra.mxu0 %v6803_v50  ;;  %5765 = vmatprep.mubr.msk.f32.mxu0 %vm6253_vm1, %v6252_v3 }
 0x222   :  { %5798 = vmatprep.subr.mxu1 %v6252_v3  ;;  %5813 = vmatprep.subr.mxu0 %v6252_v3 }
 0x223   :  { %5775 = vmatmul.mubr.f32.vlgmr.msra.gmra.mxu1 %v1873_v44 }
 0x224   :  { %5766 = vmatmul.mubr.f32.gmra.mxu0 %v6822_v59  ;;  %5799 = vmatpush3.msra.mxu1 %v6782_v20 }
 0x225   :  { %5800 = vmatprep.subr.mxu1 %v6252_v3  ;;  %5777 = vmatprep.mubr.msk.f32.mxu1 %vm6253_vm1, %v6252_v3 }
 0x226   :  { %5801 = vmatpush3.msra.mxu1 %v6767_v35  ;;  %5789 = vmatprep.mubr.msk.f32.mxu0 %vm6253_vm1, %v6252_v3 }
 0x227   :  { %5802 = vmatprep.subr.mxu1 %v6252_v3  ;;  %5778 = vmatmul.mubr.f32.gmra.mxu1 %v1883_v56 }
 0x228   :  { %5790 = vmatmul.mubr.f32.vlgmr.msra.gmra.mxu0 %v6769_v37  ;;  %5803 = vmatpush3.msra.mxu1 %v6764_v30 }
 0x229   :  { %5814 = vmatpush3.msra.mxu0 %v6782_v20  ;;  %5780 = vmatprep.mubr.msk.f32.mxu1 %vm6253_vm1, %v6252_v3 }
 0x22a   :  { %5815 = vmatprep.subr.mxu0 %v6252_v3  ;;  %5792 = vmatprep.mubr.msk.f32.mxu0 %vm6253_vm1, %v6252_v3 }
 0x22b   :  { %5816 = vmatpush3.msra.mxu0 %v6767_v35  ;;  %5781 = vmatmul.mubr.f32.gmra.mxu1 %v1893_v63 }
 0x22c   :  { %5817 = vmatprep.subr.mxu0 %v6252_v3  ;;  %5793 = vmatmul.mubr.f32.gmra.mxu0 %v6785_v12 }
 0x22d   :  { %5818 = vmatpush3.msra.mxu0 %v6764_v30  ;;  %5795 = vmatprep.mubr.msk.f32.mxu0 %vm6253_vm1, %v6252_v3 }
 0x22e   :  { %5804 = vmatprep.mubr.msk.f32.mxu1 %vm6253_vm1, %v6252_v3  ;;  %5828 = vmatprep.subr.mxu1 %v6252_v3 }
 0x22f   :  { %5805 = vmatmul.mubr.f32.vlgmr.msra.gmra.mxu1 %v6769_v37  ;;  %5843 = vmatprep.subr.mxu0 %v6252_v3 }
 0x230   :  { %5796 = vmatmul.mubr.f32.gmra.mxu0 %v6805_v52  ;;  %5829 = vmatpush3.msra.mxu1 %v6828_v34 }
 0x231   :  { %5830 = vmatprep.subr.mxu1 %v6252_v3  ;;  %5807 = vmatprep.mubr.msk.f32.mxu1 %vm6253_vm1, %v6252_v3 }
 0x232   :  { %5831 = vmatpush3.msra.mxu1 %v6836_v39  ;;  %5819 = vmatprep.mubr.msk.f32.mxu0 %vm6253_vm1, %v6252_v3 }
 0x233   :  { %5832 = vmatprep.subr.mxu1 %v6252_v3  ;;  %5808 = vmatmul.mubr.f32.gmra.mxu1 %v6785_v12 }
 0x234   :  { %5833 = vmatpush3.msra.mxu1 %v6842_v2  ;;  %5810 = vmatprep.mubr.msk.f32.mxu1 %vm6253_vm1, %v6252_v3 }
 0x235   :  { %5858 = vmatprep.subr.mxu1 %v6252_v3 }
 0x237   :  { %5811 = vmatmul.mubr.f32.gmra.mxu1 %v6805_v52 }
 0x238   :  { %5834 = vmatprep.mubr.msk.f32.mxu1 %vm6253_vm1, %v6252_v3 }
 0x2ce   :  { %v1877_v6 = vpop.f32.mrf.mxu0 }
 0x2cf   :  { %v1878_v40 = vadd.f32 %v1877_v6, %v6729_v47 }
 0x2d0   :  { %v5731_v42 = vpop.f32.mrf.mxu0 }
 0x2d2   :  { %v1887_v0 = vpop.f32.mrf.mxu0 }
 0x2d3   :  { %v1888_v14 = vadd.f32 %v1887_v0, %v6740_v55 }
 0x2d4   :  { %v5734_v13 = vpop.f32.mrf.mxu0 }
 0x2d6   :  { %v1897_v19 = vpop.f32.mrf.mxu0  ;;  %v1983_v15 = vpop.f32.mrf.mxu1 }
 0x2d7   :  { %v1984_v32 = vadd.f32 %v1983_v15, %v1878_v40  ;;  %v1898_v52 = vadd.f32 %v1897_v19, %v6748_v16 }
 0x2d8   :  { %v5737_v21 = vpop.f32.mrf.mxu0  ;;  %v5746_v53 = vpop.f32.mrf.mxu1 }
 0x2da   :  { %v2073_v22 = vpop.f32.mrf.mxu0 }
 0x2db   :  { %v1989_v51 = vpop.f32.mrf.mxu1  ;;  %v2074_v18 = vadd.f32 %v2073_v22, %v1984_v32 }
 0x2dc   :  { %v5761_v25 = vpop.f32.mrf.mxu0  ;;  %v1990_v45 = vadd.f32 %v1989_v51, %v1888_v14 }
 0x2dd   :  { %v5749_v7 = vpop.f32.mrf.mxu1 }
 0x2df   :  { %v1995_v28 = vpop.f32.mrf.mxu1 }
 0x2e0   :  { %v2080_v27 = vpop.f32.mrf.mxu0  ;;  %v1996_v58 = vadd.f32 %v1995_v28, %v1898_v52 }
 0x2e1   :  { %v5752_v24 = vpop.f32.mrf.mxu1  ;;  %v2081_v10 = vadd.f32 %v2080_v27, %v1990_v45 }
 0x2e2   :  { %v5764_v31 = vpop.f32.mrf.mxu0 }
 0x2e3   :  { %v2163_v36 = vpop.f32.mrf.mxu1 }
 0x2e4   :  { %v2087_v37 = vpop.f32.mrf.mxu0  ;;  %v2164_v26 = vadd.f32 %v2163_v36, %v2074_v18 }
 0x2e5   :  { %v5776_v38 = vpop.f32.mrf.mxu1  ;;  %v2088_v61 = vadd.f32 %v2087_v37, %v1996_v58 }
 0x2e6   :  { %v5767_v4 = vpop.f32.mrf.mxu0 }
 0x2e7   :  { %v2171_v23 = vpop.f32.mrf.mxu1 }
 0x2e8   :  { %v2259_v33 = vpop.f32.mrf.mxu0  ;;  %v2172_v54 = vadd.f32 %v2171_v23, %v2081_v10 }
 0x2e9   :  { %v5779_v43 = vpop.f32.mrf.mxu1  ;;  %v2260_v56 = vadd.f32 %v2259_v33, %v2164_v26 }
 0x2ea   :  { %v5791_v44 = vpop.f32.mrf.mxu0 }
 0x2eb   :  { %v2179_v12 = vpop.f32.mrf.mxu1 }
 0x2ec   :  { %v2265_v46 = vpop.f32.mrf.mxu0  ;;  %v2180_v5 = vadd.f32 %v2179_v12, %v2088_v61 }
 0x2ed   :  { %v5782_v49 = vpop.f32.mrf.mxu1  ;;  %v2266_v55 = vadd.f32 %v2265_v46, %v2172_v54 }
 0x2ee   :  { %v5794_v57 = vpop.f32.mrf.mxu0 }
 0x2ef   :  { %v2345_v47 = vpop.f32.mrf.mxu1 }
 0x2f0   :  { %v2271_v59 = vpop.f32.mrf.mxu0  ;;  %v2346_v34 = vadd.f32 %v2345_v47, %v2260_v56 }
 0x2f1   :  { %v5806_v8 = vpop.f32.mrf.mxu1  ;;  %v2272_v0 = vadd.f32 %v2271_v59, %v2180_v5 }
 0x2f2   :  { %v2362_v63 = vsel %vm33_vm2, %v2346_v34, 0  ;;  %v5797_v39 = vpop.f32.mrf.mxu0 }
 0x2f3   :  { %v6933_v1 = vand.u32 4294901760, %v2362_v63  ;;  %v2351_v2 = vpop.f32.mrf.mxu1 }
 0x2f4   :  { %v2352_v6 = vadd.f32 %v2351_v2, %v2266_v55 }
 0x2f5   :  { %v2439_v16 = vsub.f32 %v2362_v63, %v6933_v1  ;;  %v5809_v42 = vpop.f32.mrf.mxu1  ;;  %5835 = vmatmul.mubr.f32.vlgmr.msra.gmra.mxu1 %v6933_v1 }
 0x2f6   :  { %v2365_v13 = vsel %vm33_vm2, %v2352_v6, 0  ;;  %5859 = vmatpush3.msra.mxu1 %v6782_v20  ;;  %5837 = vmatprep.mubr.msk.f32.mxu1 %vm6253_vm1, %v6252_v3 }
 0x2f7   :  { %v2440_v19 = vand.u32 4294901760, %v2439_v16  ;;  %v6941_v15 = vand.u32 4294901760, %v2365_v13  ;;  %5860 = vmatprep.subr.mxu1 %v6252_v3  ;;  %v2357_v21 = vpop.f32.mrf.mxu1 }
 0x2f8   :  { %v2358_v53 = vadd.f32 %v2357_v21, %v2272_v0  ;;  %5861 = vmatpush3.msra.mxu1 %v6767_v35 }
 0x2f9   :  { %v2441_v22 = vsub.f32 %v2439_v16, %v2440_v19  ;;  %v2449_v51 = vsub.f32 %v2365_v13, %v6941_v15  ;;  %5862 = vmatprep.subr.mxu1 %v6252_v3  ;;  %v5812_v25 = vpop.f32.mrf.mxu1  ;;  %5838 = vmatmul.mubr.f32.gmra.mxu1 %v6941_v15 }
 0x2fa   :  { %v2368_v7 = vsel %vm33_vm2, %v2358_v53, 0  ;;  %5863 = vmatpush3.msra.mxu1 %v6764_v30  ;;  %5840 = vmatprep.mubr.msk.f32.mxu1 %vm6253_vm1, %v6252_v3 }
 0x2fb   :  { %v2442_v28 = vand.u32 4294901760, %v2441_v22  ;;  %v2458_v27 = vand.u32 4294901760, %v2368_v7  ;;  %5888 = vmatprep.subr.mxu1 %v6252_v3  ;;  %v2450_v24 = vand.u32 4294901760, %v2449_v51 }
 0x2fd   :  { %v2459_v31 = vsub.f32 %v2368_v7, %v2458_v27  ;;  %5820 = vmatmul.mubr.f32.vlgmr.msra.gmra.mxu0 %v2442_v28  ;;  %5841 = vmatmul.mubr.f32.gmra.mxu1 %v2458_v27  ;;  %v2451_v36 = vsub.f32 %v2449_v51, %v2450_v24 }
 0x2fe   :  { %5844 = vmatpush3.msra.mxu0 %v6788_v29  ;;  %5822 = vmatprep.mubr.msk.f32.mxu0 %vm6253_vm1, %v6252_v3 }
 0x2ff   :  { %5845 = vmatprep.subr.mxu0 %v6252_v3  ;;  %5864 = vmatprep.mubr.msk.f32.mxu1 %vm6253_vm1, %v6252_v3  ;;  %v2452_v37 = vand.u32 4294901760, %v2451_v36  ;;  %v2460_v38 = vand.u32 4294901760, %v2459_v31 }
 0x300   :  { %5846 = vmatpush3.msra.mxu0 %v6775_v60 }
 0x301   :  { %5847 = vmatprep.subr.mxu0 %v6252_v3  ;;  %5823 = vmatmul.mubr.f32.gmra.mxu0 %v2452_v37  ;;  %v2461_v40 = vsub.f32 %v2459_v31, %v2460_v38 }
 0x302   :  { %5848 = vmatpush3.msra.mxu0 %v6778_v41  ;;  %5865 = vmatmul.mubr.f32.vlgmr.msra.gmra.mxu1 %v2440_v19 }
 0x303   :  { %5889 = vmatpush3.msra.mxu1 %v6782_v20  ;;  %5825 = vmatprep.mubr.msk.f32.mxu0 %vm6253_vm1, %v6252_v3  ;;  %v2462_v29 = vand.u32 4294901760, %v2461_v40 }
 0x304   :  { %5890 = vmatprep.subr.mxu1 %v6252_v3  ;;  %5867 = vmatprep.mubr.msk.f32.mxu1 %vm6253_vm1, %v6252_v3 }
 0x305   :  { %5891 = vmatpush3.msra.mxu1 %v6767_v35  ;;  %5826 = vmatmul.mubr.f32.gmra.mxu0 %v2462_v29 }
 0x306   :  { %5892 = vmatprep.subr.mxu1 %v6252_v3  ;;  %5868 = vmatmul.mubr.f32.gmra.mxu1 %v2450_v24 }
 0x307   :  { %5893 = vmatpush3.msra.mxu1 %v6764_v30  ;;  %5849 = vmatprep.mubr.msk.f32.mxu0 %vm6253_vm1, %v6252_v3 }
 0x308   :  { %5870 = vmatprep.mubr.msk.f32.mxu1 %vm6253_vm1, %v6252_v3  ;;  %5873 = vmatprep.subr.mxu0 %v6252_v3 }
 0x309   :  { %5850 = vmatmul.mubr.f32.vlgmr.msra.gmra.mxu0 %v2439_v16  ;;  %5918 = vmatprep.subr.mxu1 %v6252_v3 }
 0x30a   :  { %5871 = vmatmul.mubr.f32.gmra.mxu1 %v2460_v38  ;;  %5874 = vmatpush3.msra.mxu0 %v6809_v9 }
 0x30b   :  { %5875 = vmatprep.subr.mxu0 %v6252_v3  ;;  %5852 = vmatprep.mubr.msk.f32.mxu0 %vm6253_vm1, %v6252_v3 }
 0x30c   :  { %5876 = vmatpush3.msra.mxu0 %v6798_v11  ;;  %5894 = vmatprep.mubr.msk.f32.mxu1 %vm6253_vm1, %v6252_v3 }
 0x30d   :  { %5877 = vmatprep.subr.mxu0 %v6252_v3  ;;  %5853 = vmatmul.mubr.f32.gmra.mxu0 %v2449_v51 }
 0x30e   :  { %5878 = vmatpush3.msra.mxu0 %v6803_v50  ;;  %5895 = vmatmul.mubr.f32.vlgmr.msra.gmra.mxu1 %v6933_v1 }
 0x30f   :  { %5855 = vmatprep.mubr.msk.f32.mxu0 %vm6253_vm1, %v6252_v3  ;;  %5897 = vmatprep.mubr.msk.f32.mxu1 %vm6253_vm1, %v6252_v3 }
 0x310   :  { %5903 = vmatprep.subr.mxu0 %v6252_v3 }
 0x311   :  { %5856 = vmatmul.mubr.f32.gmra.mxu0 %v2459_v31 }
 0x312   :  { %5898 = vmatmul.mubr.f32.gmra.mxu1 %v6941_v15  ;;  %5879 = vmatprep.mubr.msk.f32.mxu0 %vm6253_vm1, %v6252_v3 }
 0x313   :  { %5900 = vmatprep.mubr.msk.f32.mxu1 %vm6253_vm1, %v6252_v3 }
 0x315   :  { %5880 = vmatmul.mubr.f32.vlgmr.msra.gmra.mxu0 %v6933_v1 }
 0x316   :  { %5901 = vmatmul.mubr.f32.gmra.mxu1 %v2458_v27  ;;  %5882 = vmatprep.mubr.msk.f32.mxu0 %vm6253_vm1, %v6252_v3 }
 0x317   :  { %5924 = vmatprep.mubr.msk.f32.mxu1 %vm6253_vm1, %v6252_v3 }
 0x319   :  { %5883 = vmatmul.mubr.f32.gmra.mxu0 %v6941_v15 }
 0x31a   :  { %5885 = vmatprep.mubr.msk.f32.mxu0 %vm6253_vm1, %v6252_v3 }
 0x31d   :  { %5886 = vmatmul.mubr.f32.gmra.mxu0 %v2458_v27 }
 0x31e   :  { %5909 = vmatprep.mubr.msk.f32.mxu0 %vm6253_vm1, %v6252_v3 }
 0x3b5   :  { %v2550_v30 = vpop.f32.mrf.mxu1 }
 0x3b7   :  { %v5836_v35 = vpop.f32.mrf.mxu1 }
 0x3b9   :  { %v2556_v60 = vpop.f32.mrf.mxu1 }
 0x3bb   :  { %v5839_v41 = vpop.f32.mrf.mxu1 }
 0x3bd   :  { %v2444_v20 = vpop.f32.mrf.mxu0  ;;  %v2562_v11 = vpop.f32.mrf.mxu1 }
 0x3be   :  { %v2445_v45 = vadd.f32 %v2444_v20, %v6731_v48 }
 0x3bf   :  { %v5821_v50 = vpop.f32.mrf.mxu0  ;;  %v5842_v9 = vpop.f32.mrf.mxu1 }
 0x3c0   :  { %v2551_v56 = vadd.f32 %v2550_v30, %v2445_v45 }
 0x3c1   :  { %v2454_v4 = vpop.f32.mrf.mxu0 }
 0x3c2   :  { %v2730_v23 = vpop.f32.mrf.mxu1  ;;  %v2455_v10 = vadd.f32 %v2454_v4, %v6742_v62 }
 0x3c3   :  { %v5824_v32 = vpop.f32.mrf.mxu0 }
 0x3c4   :  { %v5866_v33 = vpop.f32.mrf.mxu1  ;;  %v2557_v8 = vadd.f32 %v2556_v60, %v2455_v10 }
 0x3c5   :  { %v2464_v43 = vpop.f32.mrf.mxu0 }
 0x3c6   :  { %v2738_v14 = vpop.f32.mrf.mxu1  ;;  %v2465_v34 = vadd.f32 %v2464_v43, %v6750_v17 }
 0x3c7   :  { %v5827_v18 = vpop.f32.mrf.mxu0 }
 0x3c8   :  { %v5869_v44 = vpop.f32.mrf.mxu1  ;;  %v2563_v2 = vadd.f32 %v2562_v11, %v2465_v34 }
 0x3c9   :  { %v2640_v12 = vpop.f32.mrf.mxu0 }
 0x3ca   :  { %v2746_v26 = vpop.f32.mrf.mxu1  ;;  %v2641_v58 = vadd.f32 %v2640_v12, %v2551_v56 }
 0x3cb   :  { %v5851_v46 = vpop.f32.mrf.mxu0 }
 0x3cc   :  { %v5872_v49 = vpop.f32.mrf.mxu1  ;;  %v2731_v48 = vadd.f32 %v2730_v23, %v2641_v58 }
 0x3cd   :  { %v2647_v52 = vpop.f32.mrf.mxu0 }
 0x3ce   :  { %v2912_v57 = vpop.f32.mrf.mxu1  ;;  %v2648_v63 = vadd.f32 %v2647_v52, %v2557_v8 }
 0x3cf   :  { %v5854_v47 = vpop.f32.mrf.mxu0 }
 0x3d0   :  { %v5896_v54 = vpop.f32.mrf.mxu1  ;;  %v2739_v13 = vadd.f32 %v2738_v14, %v2648_v63 }
 0x3d1   :  { %v2654_v59 = vpop.f32.mrf.mxu0 }
 0x3d2   :  { %v2918_v61 = vpop.f32.mrf.mxu1  ;;  %v2655_v62 = vadd.f32 %v2654_v59, %v2563_v2 }
 0x3d3   :  { %v5857_v55 = vpop.f32.mrf.mxu0 }
 0x3d4   :  { %v5899_v39 = vpop.f32.mrf.mxu1  ;;  %v2747_v51 = vadd.f32 %v2746_v26, %v2655_v62 }
 0x3d5   :  { %v2826_v1 = vpop.f32.mrf.mxu0 }
 0x3d6   :  { %v2827_v5 = vadd.f32 %v2826_v1, %v2731_v48  ;;  %v2924_v6 = vpop.f32.mrf.mxu1 }
 0x3d7   :  { %v5881_v16 = vpop.f32.mrf.mxu0 }
 0x3d8   :  { %v7010_v42 = vadd.f32 %v2912_v57, %v2827_v5  ;;  %v5902_v0 = vpop.f32.mrf.mxu1 }
 0x3d9   :  { %v2832_v19 = vpop.f32.mrf.mxu0 }
 0x3da   :  { %v2932_v17 = vsel %vm33_vm2, %v7010_v42, 0  ;;  %v2833_v15 = vadd.f32 %v2832_v19, %v2739_v13  ;;  %v7027_v36 = vand.u32 4294901760, %v7010_v42  ;;  %v2928_v0 = vmul.f32 2.0, %v7010_v42 }
 0x3db   :  { %v7014_v21 = vand.u32 4294901760, %v2932_v17  ;;  %v5884_v53 = vpop.f32.mrf.mxu0 }
 0x3dc   :  { %v7016_v22 = vadd.f32 %v2918_v61, %v2833_v15  ;;  %v3082_v11 = vsub.f32 %v7010_v42, %v7027_v36 }
 0x3dd   :  { %v7019_v25 = vsub.f32 %v2932_v17, %v7014_v21  ;;  %v2838_v7 = vpop.f32.mrf.mxu0 }
 0x3de   :  { %v2839_v28 = vadd.f32 %v2838_v7, %v2747_v51  ;;  %v7022_v27 = vand.u32 4294901760, %v7016_v22  ;;  %v2935_v24 = vsel %vm33_vm2, %v7016_v22, 0  ;;  %v3083_v43 = vand.u32 4294901760, %v3082_v11 }
 0x3df   :  { %v5887_v31 = vpop.f32.mrf.mxu0  ;;  %v7029_v37 = vand.u32 4294901760, %v2935_v24  ;;  %v3012_v40 = vand.u32 4294901760, %v7019_v25  ;;  %v2929_v53 = vmul.f32 2.0, %v7016_v22 }
 0x3e0   :  { %v7031_v38 = vadd.f32 %v2924_v6, %v2839_v28  ;;  %v3075_v29 = vsub.f32 %v7016_v22, %v7022_v27  ;;  %v3084_v46 = vsub.f32 %v3082_v11, %v3083_v43 }
 0x3e1   :  { %v7037_v30 = vsub.f32 %v2935_v24, %v7029_v37  ;;  %v3013_v50 = vsub.f32 %v7019_v25, %v3012_v40 }
 0x3e2   :  { %v2938_v35 = vsel %vm33_vm2, %v7031_v38, 0  ;;  %v2940_v60 = vsel %vm43_vm0, %v7031_v38, 0  ;;  %v3076_v32 = vand.u32 4294901760, %v3075_v29  ;;  %v3085_v56 = vand.u32 4294901760, %v3084_v46 }
 0x3e3   :  { %v7043_v41 = vand.u32 4294901760, %v2938_v35  ;;  %v7045_v20 = vand.u32 4294901760, %v2940_v60  ;;  %v3022_v9 = vand.u32 4294901760, %v7037_v30  ;;  %v3014_v14 = vand.u32 4294901760, %v3013_v50 }
 0x3e4   :  { %v3077_v45 = vsub.f32 %v3075_v29, %v3076_v32 }
 0x3e5   :  { %v7054_v4 = vsub.f32 %v2938_v35, %v7043_v41  ;;  %5904 = vmatpush3.msra.mxu0 %v7045_v20  ;;  %v3068_v23 = vsub.f32 %v2940_v60, %v7045_v20  ;;  %v3023_v18 = vsub.f32 %v7037_v30, %v3022_v9 }
 0x3e6   :  { %5905 = vmatprep.subr.mxu0 %v6252_v3  ;;  %v3078_v10 = vand.u32 4294901760, %v3077_v45 }
 0x3e7   :  { %5906 = vmatpush3.msra.mxu0 %v7022_v27  ;;  %v3069_v33 = vand.u32 4294901760, %v3068_v23  ;;  %v3032_v44 = vand.u32 4294901760, %v7054_v4  ;;  %v3024_v49 = vand.u32 4294901760, %v3023_v18 }
 0x3e8   :  { %5907 = vmatprep.subr.mxu0 %v6252_v3 }
 0x3e9   :  { %5908 = vmatpush3.msra.mxu0 %v7027_v36  ;;  %v3070_v12 = vsub.f32 %v3068_v23, %v3069_v33  ;;  %v3033_v52 = vsub.f32 %v7054_v4, %v3032_v44 }
 0x3ea   :  { %5910 = vmatmul.mubr.f32.vlgmr.msra.gmra.mxu0 %v3014_v14  ;;  %5933 = vmatprep.subr.mxu0 %v6252_v3 }
 0x3eb   :  { %5934 = vmatpush3.msra.mxu0 %v3068_v23  ;;  %5912 = vmatprep.mubr.msk.f32.mxu0 %vm6253_vm1, %v6252_v3  ;;  %v3071_v26 = vand.u32 4294901760, %v3070_v12  ;;  %v3034_v57 = vand.u32 4294901760, %v3033_v52 }
 0x3ec   :  { %5935 = vmatprep.subr.mxu0 %v6252_v3 }
 0x3ed   :  { %5919 = vmatpush3.msra.mxu1 %v3071_v26  ;;  %5936 = vmatpush3.msra.mxu0 %v3075_v29 }
 0x3ee   :  { %5913 = vmatmul.mubr.f32.gmra.mxu0 %v3024_v49  ;;  %5920 = vmatprep.subr.mxu1 %v6252_v3 }
 0x3ef   :  { %5937 = vmatprep.subr.mxu0 %v6252_v3  ;;  %5921 = vmatpush3.msra.mxu1 %v3078_v10 }
 0x3f0   :  { %5938 = vmatpush3.msra.mxu0 %v3082_v11  ;;  %5922 = vmatprep.subr.mxu1 %v6252_v3 }
 0x3f1   :  { %5915 = vmatprep.mubr.msk.f32.mxu0 %vm6253_vm1, %v6252_v3  ;;  %5923 = vmatpush3.msra.mxu1 %v3085_v56 }
 0x3f2   :  { %5916 = vmatmul.mubr.f32.gmra.mxu0 %v3034_v57  ;;  %5925 = vmatmul.mubr.f32.vlgmr.msra.gmra.mxu1 %v7014_v21 }
 0x3f3   :  { %5948 = vmatprep.subr.mxu1 %v6252_v3  ;;  %5927 = vmatprep.mubr.msk.f32.mxu1 %vm6253_vm1, %v6252_v3 }
 0x3f4   :  { %5949 = vmatpush3.msra.mxu1 %v7045_v20  ;;  %5939 = vmatprep.mubr.msk.f32.mxu0 %vm6253_vm1, %v6252_v3 }
 0x3f5   :  { %5950 = vmatprep.subr.mxu1 %v6252_v3  ;;  %5963 = vmatprep.subr.mxu0 %v6252_v3 }
 0x3f6   :  { %5951 = vmatpush3.msra.mxu1 %v7022_v27  ;;  %5940 = vmatmul.mubr.f32.vlgmr.msra.gmra.mxu0 %v7019_v25 }
 0x3f7   :  { %5928 = vmatmul.mubr.f32.gmra.mxu1 %v7029_v37  ;;  %5952 = vmatprep.subr.mxu1 %v6252_v3 }
 0x3f8   :  { %5964 = vmatpush3.msra.mxu0 %v3069_v33  ;;  %5953 = vmatpush3.msra.mxu1 %v7027_v36 }
 0x3f9   :  { %5965 = vmatprep.subr.mxu0 %v6252_v3  ;;  %5930 = vmatprep.mubr.msk.f32.mxu1 %vm6253_vm1, %v6252_v3 }
 0x3fa   :  { %5966 = vmatpush3.msra.mxu0 %v3076_v32  ;;  %5942 = vmatprep.mubr.msk.f32.mxu0 %vm6253_vm1, %v6252_v3 }
 0x3fb   :  { %5967 = vmatprep.subr.mxu0 %v6252_v3  ;;  %5931 = vmatmul.mubr.f32.gmra.mxu1 %v7043_v41 }
 0x3fc   :  { %5943 = vmatmul.mubr.f32.gmra.mxu0 %v7037_v30  ;;  %5954 = vmatprep.mubr.msk.f32.mxu1 %vm6253_vm1, %v6252_v3 }
 0x3fd   :  { %5968 = vmatpush3.msra.mxu0 %v3083_v43  ;;  %5945 = vmatprep.mubr.msk.f32.mxu0 %vm6253_vm1, %v6252_v3 }
 0x3fe   :  { %5978 = vmatprep.subr.mxu1 %v6252_v3  ;;  %5993 = vmatprep.subr.mxu0 %v6252_v3 }
 0x3ff   :  { %5955 = vmatmul.mubr.f32.vlgmr.msra.gmra.mxu1 %v3012_v40 }
 0x400   :  { %5946 = vmatmul.mubr.f32.gmra.mxu0 %v7054_v4  ;;  %5979 = vmatpush3.msra.mxu1 %v7045_v20 }
 0x401   :  { %5980 = vmatprep.subr.mxu1 %v6252_v3  ;;  %5957 = vmatprep.mubr.msk.f32.mxu1 %vm6253_vm1, %v6252_v3 }
 0x402   :  { %5981 = vmatpush3.msra.mxu1 %v7022_v27  ;;  %5969 = vmatprep.mubr.msk.f32.mxu0 %vm6253_vm1, %v6252_v3 }
 0x403   :  { %5982 = vmatprep.subr.mxu1 %v6252_v3  ;;  %5958 = vmatmul.mubr.f32.gmra.mxu1 %v3022_v9 }
 0x404   :  { %5970 = vmatmul.mubr.f32.vlgmr.msra.gmra.mxu0 %v7014_v21  ;;  %5983 = vmatpush3.msra.mxu1 %v7027_v36  ;;  %v2930_v36 = vmul.f32 2.0, %v7031_v38 }
 0x405   :  { %5960 = vmatprep.mubr.msk.f32.mxu1 %vm6253_vm1, %v6252_v3  ;;  %5972 = vmatprep.mubr.msk.f32.mxu0 %vm6253_vm1, %v6252_v3 }
 0x406   :  { %6008 = vmatprep.subr.mxu1 %v6252_v3 }
 0x407   :  { %5961 = vmatmul.mubr.f32.gmra.mxu1 %v3032_v44 }
 0x408   :  { %5973 = vmatmul.mubr.f32.gmra.mxu0 %v7029_v37  ;;  %5984 = vmatprep.mubr.msk.f32.mxu1 %vm6253_vm1, %v6252_v3 }
 0x409   :  { %5975 = vmatprep.mubr.msk.f32.mxu0 %vm6253_vm1, %v6252_v3 }
 0x40b   :  { %5985 = vmatmul.mubr.f32.vlgmr.msra.gmra.mxu1 %v7014_v21 }
 0x40c   :  { %5976 = vmatmul.mubr.f32.gmra.mxu0 %v7043_v41  ;;  %5987 = vmatprep.mubr.msk.f32.mxu1 %vm6253_vm1, %v6252_v3 }
 0x40d   :  { %5999 = vmatprep.mubr.msk.f32.mxu0 %vm6253_vm1, %v6252_v3 }
 0x40f   :  { %5988 = vmatmul.mubr.f32.gmra.mxu1 %v7029_v37 }
 0x410   :  { %5990 = vmatprep.mubr.msk.f32.mxu1 %vm6253_vm1, %v6252_v3 }
 0x413   :  { %5991 = vmatmul.mubr.f32.gmra.mxu1 %v7043_v41 }
 0x414   :  { %6014 = vmatprep.mubr.msk.f32.mxu1 %vm6253_vm1, %v6252_v3 }
 0x4aa   :  { %v3016_v47 = vpop.f32.mrf.mxu0 }
 0x4ab   :  { %v3017_v17 = vadd.f32 %v3016_v47, %v2928_v0 }
 0x4ac   :  { %v5911_v58 = vpop.f32.mrf.mxu0 }
 0x4ae   :  { %v3026_v54 = vpop.f32.mrf.mxu0 }
 0x4af   :  { %v3027_v28 = vadd.f32 %v3026_v54, %v2929_v53 }
 0x4b0   :  { %v5914_v59 = vpop.f32.mrf.mxu0 }
 0x4b2   :  { %v3036_v34 = vpop.f32.mrf.mxu0  ;;  %v3122_v8 = vpop.f32.mrf.mxu1 }
 0x4b3   :  { %v3123_v51 = vadd.f32 %v3122_v8, %v3017_v17  ;;  %v3037_v30 = vadd.f32 %v3036_v34, %v2930_v36 }
 0x4b4   :  { %v5917_v61 = vpop.f32.mrf.mxu0  ;;  %v5926_v55 = vpop.f32.mrf.mxu1 }
 0x4b6   :  { %v3212_v63 = vpop.f32.mrf.mxu0 }
 0x4b7   :  { %v3128_v39 = vpop.f32.mrf.mxu1  ;;  %v3213_v27 = vadd.f32 %v3212_v63, %v3123_v51 }
 0x4b8   :  { %v5941_v48 = vpop.f32.mrf.mxu0  ;;  %v3129_v37 = vadd.f32 %v3128_v39, %v3027_v28 }
 0x4b9   :  { %v5929_v1 = vpop.f32.mrf.mxu1 }
 0x4bb   :  { %v3134_v2 = vpop.f32.mrf.mxu1 }
 0x4bc   :  { %v3219_v5 = vpop.f32.mrf.mxu0  ;;  %v3135_v11 = vadd.f32 %v3134_v2, %v3037_v30 }
 0x4bd   :  { %v5932_v6 = vpop.f32.mrf.mxu1  ;;  %v3220_v35 = vadd.f32 %v3219_v5, %v3129_v37 }
 0x4be   :  { %v5944_v16 = vpop.f32.mrf.mxu0 }
 0x4bf   :  { %v3302_v62 = vpop.f32.mrf.mxu1 }
 0x4c0   :  { %v3226_v13 = vpop.f32.mrf.mxu0  ;;  %v3303_v40 = vadd.f32 %v3302_v62, %v3213_v27 }
 0x4c1   :  { %v5956_v19 = vpop.f32.mrf.mxu1  ;;  %v3227_v23 = vadd.f32 %v3226_v13, %v3135_v11 }
 0x4c2   :  { %v5947_v15 = vpop.f32.mrf.mxu0 }
 0x4c3   :  { %v3310_v21 = vpop.f32.mrf.mxu1 }
 0x4c4   :  { %v3398_v25 = vpop.f32.mrf.mxu0  ;;  %v3311_v22 = vadd.f32 %v3310_v21, %v3220_v35 }
 0x4c5   :  { %v5959_v7 = vpop.f32.mrf.mxu1  ;;  %v3399_v60 = vadd.f32 %v3398_v25, %v3303_v40 }
 0x4c6   :  { %v5971_v24 = vpop.f32.mrf.mxu0 }
 0x4c7   :  { %v3318_v31 = vpop.f32.mrf.mxu1 }
 0x4c8   :  { %v3404_v29 = vpop.f32.mrf.mxu0  ;;  %v3319_v18 = vadd.f32 %v3318_v31, %v3227_v23 }
 0x4c9   :  { %v5962_v42 = vpop.f32.mrf.mxu1  ;;  %v3405_v32 = vadd.f32 %v3404_v29, %v3311_v22 }
 0x4ca   :  { %v5974_v41 = vpop.f32.mrf.mxu0 }
 0x4cb   :  { %v3484_v20 = vpop.f32.mrf.mxu1 }
 0x4cc   :  { %v3410_v50 = vpop.f32.mrf.mxu0  ;;  %v7148_v9 = vadd.f32 %v3484_v20, %v3399_v60 }
 0x4cd   :  { %v5986_v4 = vpop.f32.mrf.mxu1  ;;  %v3411_v26 = vadd.f32 %v3410_v50, %v3319_v18 }
 0x4ce   :  { %v3504_v38 = vsel %vm33_vm2, %v7148_v9, 0  ;;  %v5977_v33 = vpop.f32.mrf.mxu0  ;;  %v7167_v56 = vand.u32 4294901760, %v7148_v9  ;;  %v3500_v23 = vmul.f32 2.0, %v7148_v9 }
 0x4cf   :  { %v7152_v43 = vand.u32 4294901760, %v3504_v38  ;;  %v3490_v14 = vpop.f32.mrf.mxu1 }
 0x4d0   :  { %v7154_v44 = vadd.f32 %v3490_v14, %v3405_v32  ;;  %v3654_v63 = vsub.f32 %v7148_v9, %v7167_v56 }
 0x4d1   :  { %v7157_v12 = vsub.f32 %v3504_v38, %v7152_v43  ;;  %v5989_v45 = vpop.f32.mrf.mxu1 }
 0x4d2   :  { %v3507_v46 = vsel %vm33_vm2, %v7154_v44, 0  ;;  %v7162_v49 = vand.u32 4294901760, %v7154_v44  ;;  %v3655_v16 = vand.u32 4294901760, %v3654_v63  ;;  %v3501_v18 = vmul.f32 2.0, %v7154_v44 }
 0x4d3   :  { %v7164_v52 = vand.u32 4294901760, %v3507_v46  ;;  %v3496_v10 = vpop.f32.mrf.mxu1  ;;  %v3584_v57 = vand.u32 4294901760, %v7157_v12 }
 0x4d4   :  { %v7170_v47 = vadd.f32 %v3496_v10, %v3411_v26  ;;  %v3647_v54 = vsub.f32 %v7154_v44, %v7162_v49  ;;  %v3656_v21 = vsub.f32 %v3654_v63, %v3655_v16 }
 0x4d5   :  { %v5992_v58 = vpop.f32.mrf.mxu1  ;;  %v7175_v59 = vsub.f32 %v3507_v46, %v7164_v52  ;;  %v3585_v39 = vsub.f32 %v7157_v12, %v3584_v57 }
 0x4d6   :  { %v3510_v34 = vsel %vm33_vm2, %v7170_v47, 0  ;;  %v3512_v8 = vsel %vm43_vm0, %v7170_v47, 0  ;;  %v3648_v5 = vand.u32 4294901760, %v3647_v54  ;;  %v3657_v7 = vand.u32 4294901760, %v3656_v21 }
 0x4d7   :  { %v7181_v61 = vand.u32 4294901760, %v3512_v8  ;;  %v7183_v55 = vand.u32 4294901760, %v3510_v34  ;;  %v3594_v48 = vand.u32 4294901760, %v7175_v59  ;;  %v3586_v62 = vand.u32 4294901760, %v3585_v39 }
 0x4d8   :  { %v3649_v17 = vsub.f32 %v3647_v54, %v3648_v5 }
 0x4d9   :  { %v7192_v1 = vsub.f32 %v3510_v34, %v7183_v55  ;;  %v3640_v2 = vsub.f32 %v3512_v8, %v7181_v61  ;;  %5994 = vmatpush3.msra.mxu0 %v7181_v61  ;;  %v3595_v0 = vsub.f32 %v7175_v59, %v3594_v48 }
 0x4da   :  { %5995 = vmatprep.subr.mxu0 %v6252_v3  ;;  %v3650_v25 = vand.u32 4294901760, %v3649_v17 }
 0x4db   :  { %5996 = vmatpush3.msra.mxu0 %v7162_v49  ;;  %v3641_v6 = vand.u32 4294901760, %v3640_v2  ;;  %v3604_v13 = vand.u32 4294901760, %v7192_v1  ;;  %v3596_v53 = vand.u32 4294901760, %v3595_v0 }
 0x4dc   :  { %5997 = vmatprep.subr.mxu0 %v6252_v3 }
 0x4dd   :  { %5998 = vmatpush3.msra.mxu0 %v7167_v56  ;;  %v3642_v19 = vsub.f32 %v3640_v2, %v3641_v6  ;;  %v3605_v51 = vsub.f32 %v7192_v1, %v3604_v13 }
 0x4de   :  { %6000 = vmatmul.mubr.f32.vlgmr.msra.gmra.mxu0 %v3586_v62  ;;  %6023 = vmatprep.subr.mxu0 %v6252_v3 }
 0x4df   :  { %6024 = vmatpush3.msra.mxu0 %v3640_v2  ;;  %6002 = vmatprep.mubr.msk.f32.mxu0 %vm6253_vm1, %v6252_v3  ;;  %v3643_v15 = vand.u32 4294901760, %v3642_v19  ;;  %v3606_v28 = vand.u32 4294901760, %v3605_v51 }
 0x4e0   :  { %6025 = vmatprep.subr.mxu0 %v6252_v3 }
 0x4e1   :  { %6009 = vmatpush3.msra.mxu1 %v3643_v15  ;;  %6026 = vmatpush3.msra.mxu0 %v3647_v54 }
 0x4e2   :  { %6003 = vmatmul.mubr.f32.gmra.mxu0 %v3596_v53  ;;  %6010 = vmatprep.subr.mxu1 %v6252_v3 }
 0x4e3   :  { %6027 = vmatprep.subr.mxu0 %v6252_v3  ;;  %6011 = vmatpush3.msra.mxu1 %v3650_v25 }
 0x4e4   :  { %6028 = vmatpush3.msra.mxu0 %v3654_v63  ;;  %6012 = vmatprep.subr.mxu1 %v6252_v3 }
 0x4e5   :  { %6005 = vmatprep.mubr.msk.f32.mxu0 %vm6253_vm1, %v6252_v3  ;;  %6013 = vmatpush3.msra.mxu1 %v3657_v7 }
 0x4e6   :  { %6006 = vmatmul.mubr.f32.gmra.mxu0 %v3606_v28  ;;  %6015 = vmatmul.mubr.f32.vlgmr.msra.gmra.mxu1 %v7152_v43 }
 0x4e7   :  { %6038 = vmatprep.subr.mxu1 %v6252_v3  ;;  %6017 = vmatprep.mubr.msk.f32.mxu1 %vm6253_vm1, %v6252_v3 }
 0x4e8   :  { %6039 = vmatpush3.msra.mxu1 %v7181_v61  ;;  %6029 = vmatprep.mubr.msk.f32.mxu0 %vm6253_vm1, %v6252_v3 }
 0x4e9   :  { %6040 = vmatprep.subr.mxu1 %v6252_v3  ;;  %6053 = vmatprep.subr.mxu0 %v6252_v3 }
 0x4ea   :  { %6041 = vmatpush3.msra.mxu1 %v7162_v49  ;;  %6030 = vmatmul.mubr.f32.vlgmr.msra.gmra.mxu0 %v7157_v12 }
 0x4eb   :  { %6018 = vmatmul.mubr.f32.gmra.mxu1 %v7164_v52  ;;  %6042 = vmatprep.subr.mxu1 %v6252_v3 }
 0x4ec   :  { %6054 = vmatpush3.msra.mxu0 %v3641_v6  ;;  %6043 = vmatpush3.msra.mxu1 %v7167_v56 }
 0x4ed   :  { %6055 = vmatprep.subr.mxu0 %v6252_v3  ;;  %6020 = vmatprep.mubr.msk.f32.mxu1 %vm6253_vm1, %v6252_v3 }
 0x4ee   :  { %6056 = vmatpush3.msra.mxu0 %v3648_v5  ;;  %6032 = vmatprep.mubr.msk.f32.mxu0 %vm6253_vm1, %v6252_v3 }
 0x4ef   :  { %6057 = vmatprep.subr.mxu0 %v6252_v3  ;;  %6021 = vmatmul.mubr.f32.gmra.mxu1 %v7183_v55 }
 0x4f0   :  { %6033 = vmatmul.mubr.f32.gmra.mxu0 %v7175_v59  ;;  %6044 = vmatprep.mubr.msk.f32.mxu1 %vm6253_vm1, %v6252_v3 }
 0x4f1   :  { %6058 = vmatpush3.msra.mxu0 %v3655_v16  ;;  %6035 = vmatprep.mubr.msk.f32.mxu0 %vm6253_vm1, %v6252_v3 }
 0x4f2   :  { %6068 = vmatprep.subr.mxu1 %v6252_v3  ;;  %6083 = vmatprep.subr.mxu0 %v6252_v3 }
 0x4f3   :  { %6045 = vmatmul.mubr.f32.vlgmr.msra.gmra.mxu1 %v3584_v57 }
 0x4f4   :  { %6036 = vmatmul.mubr.f32.gmra.mxu0 %v7192_v1  ;;  %6069 = vmatpush3.msra.mxu1 %v7181_v61 }
 0x4f5   :  { %6070 = vmatprep.subr.mxu1 %v6252_v3  ;;  %6047 = vmatprep.mubr.msk.f32.mxu1 %vm6253_vm1, %v6252_v3 }
 0x4f6   :  { %6071 = vmatpush3.msra.mxu1 %v7162_v49  ;;  %6059 = vmatprep.mubr.msk.f32.mxu0 %vm6253_vm1, %v6252_v3 }
 0x4f7   :  { %6072 = vmatprep.subr.mxu1 %v6252_v3  ;;  %6048 = vmatmul.mubr.f32.gmra.mxu1 %v3594_v48 }
 0x4f8   :  { %6060 = vmatmul.mubr.f32.vlgmr.msra.gmra.mxu0 %v7152_v43  ;;  %6073 = vmatpush3.msra.mxu1 %v7167_v56  ;;  %v3502_v56 = vmul.f32 2.0, %v7170_v47 }
 0x4f9   :  { %6050 = vmatprep.mubr.msk.f32.mxu1 %vm6253_vm1, %v6252_v3  ;;  %6062 = vmatprep.mubr.msk.f32.mxu0 %vm6253_vm1, %v6252_v3 }
 0x4fa   :  { %6098 = vmatprep.subr.mxu1 %v6252_v3 }
 0x4fb   :  { %6051 = vmatmul.mubr.f32.gmra.mxu1 %v3604_v13 }
 0x4fc   :  { %6063 = vmatmul.mubr.f32.gmra.mxu0 %v7164_v52  ;;  %6074 = vmatprep.mubr.msk.f32.mxu1 %vm6253_vm1, %v6252_v3 }
 0x4fd   :  { %6065 = vmatprep.mubr.msk.f32.mxu0 %vm6253_vm1, %v6252_v3 }
 0x4ff   :  { %6075 = vmatmul.mubr.f32.vlgmr.msra.gmra.mxu1 %v7152_v43 }
 0x500   :  { %6066 = vmatmul.mubr.f32.gmra.mxu0 %v7183_v55  ;;  %6077 = vmatprep.mubr.msk.f32.mxu1 %vm6253_vm1, %v6252_v3 }
 0x501   :  { %6089 = vmatprep.mubr.msk.f32.mxu0 %vm6253_vm1, %v6252_v3 }
 0x503   :  { %6078 = vmatmul.mubr.f32.gmra.mxu1 %v7164_v52 }
 0x504   :  { %6080 = vmatprep.mubr.msk.f32.mxu1 %vm6253_vm1, %v6252_v3 }
 0x507   :  { %6081 = vmatmul.mubr.f32.gmra.mxu1 %v7183_v55 }
 0x508   :  { %6104 = vmatprep.mubr.msk.f32.mxu1 %vm6253_vm1, %v6252_v3 }
 0x59e   :  { %v3588_v27 = vpop.f32.mrf.mxu0 }
 0x59f   :  { %v3589_v33 = vadd.f32 %v3588_v27, %v3500_v23 }
 0x5a0   :  { %v6001_v24 = vpop.f32.mrf.mxu0 }
 0x5a2   :  { %v3598_v31 = vpop.f32.mrf.mxu0 }
 0x5a3   :  { %v3599_v46 = vadd.f32 %v3598_v31, %v3501_v18 }
 0x5a4   :  { %v6004_v36 = vpop.f32.mrf.mxu0 }
 0x5a6   :  { %v3608_v37 = vpop.f32.mrf.mxu0  ;;  %v3694_v40 = vpop.f32.mrf.mxu1 }
 0x5a7   :  { %v3695_v12 = vadd.f32 %v3694_v40, %v3589_v33  ;;  %v3609_v59 = vadd.f32 %v3608_v37, %v3502_v56 }
 0x5a8   :  { %v6007_v29 = vpop.f32.mrf.mxu0  ;;  %v6016_v42 = vpop.f32.mrf.mxu1 }
 0x5aa   :  { %v3784_v30 = vpop.f32.mrf.mxu0 }
 0x5ab   :  { %v3700_v35 = vpop.f32.mrf.mxu1  ;;  %v3785_v49 = vadd.f32 %v3784_v30, %v3695_v12 }
 0x5ac   :  { %v6031_v60 = vpop.f32.mrf.mxu0  ;;  %v3701_v57 = vadd.f32 %v3700_v35, %v3599_v46 }
 0x5ad   :  { %v6019_v41 = vpop.f32.mrf.mxu1 }
 0x5af   :  { %v3706_v20 = vpop.f32.mrf.mxu1 }
 0x5b0   :  { %v3791_v11 = vpop.f32.mrf.mxu0  ;;  %v3707_v63 = vadd.f32 %v3706_v20, %v3609_v59 }
 0x5b1   :  { %v6022_v22 = vpop.f32.mrf.mxu1  ;;  %v3792_v34 = vadd.f32 %v3791_v11, %v3701_v57 }
 0x5b2   :  { %v6034_v50 = vpop.f32.mrf.mxu0 }
 0x5b3   :  { %v3874_v4 = vpop.f32.mrf.mxu1 }
 0x5b4   :  { %v3798_v32 = vpop.f32.mrf.mxu0  ;;  %v3875_v58 = vadd.f32 %v3874_v4, %v3785_v49 }
 0x5b5   :  { %v6046_v38 = vpop.f32.mrf.mxu1  ;;  %v3799_v2 = vadd.f32 %v3798_v32, %v3707_v63 }
 0x5b6   :  { %v6037_v43 = vpop.f32.mrf.mxu0 }
 0x5b7   :  { %v3882_v14 = vpop.f32.mrf.mxu1 }
 0x5b8   :  { %v3970_v45 = vpop.f32.mrf.mxu0  ;;  %v3883_v44 = vadd.f32 %v3882_v14, %v3792_v34 }
 0x5b9   :  { %v6049_v26 = vpop.f32.mrf.mxu1  ;;  %v3971_v8 = vadd.f32 %v3970_v45, %v3875_v58 }
 0x5ba   :  { %v6061_v52 = vpop.f32.mrf.mxu0 }
 0x5bb   :  { %v3890_v10 = vpop.f32.mrf.mxu1 }
 0x5bc   :  { %v3976_v54 = vpop.f32.mrf.mxu0  ;;  %v3891_v0 = vadd.f32 %v3890_v10, %v3799_v2 }
 0x5bd   :  { %v6052_v9 = vpop.f32.mrf.mxu1  ;;  %v3977_v5 = vadd.f32 %v3976_v54, %v3883_v44 }
 0x5be   :  { %v6064_v61 = vpop.f32.mrf.mxu0 }
 0x5bf   :  { %v4056_v55 = vpop.f32.mrf.mxu1 }
 0x5c0   :  { %v3982_v39 = vpop.f32.mrf.mxu0  ;;  %v7286_v48 = vadd.f32 %v4056_v55, %v3971_v8 }
 0x5c1   :  { %v6076_v1 = vpop.f32.mrf.mxu1  ;;  %v3983_v15 = vadd.f32 %v3982_v39, %v3891_v0 }
 0x5c2   :  { %v4076_v47 = vsel %vm33_vm2, %v7286_v48, 0  ;;  %v6067_v6 = vpop.f32.mrf.mxu0  ;;  %v7305_v7 = vand.u32 4294901760, %v7286_v48 }
 0x5c3   :  { %v7290_v16 = vand.u32 4294901760, %v4076_v47  ;;  %v4062_v62 = vpop.f32.mrf.mxu1  ;;  %v4072_v6 = vmul.f32 2.0, %v7286_v48 }
 0x5c4   :  { %v7292_v13 = vadd.f32 %v4062_v62, %v3977_v5  ;;  %v4226_v30 = vsub.f32 %v7286_v48, %v7305_v7 }
 0x5c5   :  { %v7295_v19 = vsub.f32 %v4076_v47, %v7290_v16  ;;  %v6079_v17 = vpop.f32.mrf.mxu1 }
 0x5c6   :  { %v4079_v21 = vsel %vm33_vm2, %v7292_v13, 0  ;;  %v7300_v53 = vand.u32 4294901760, %v7292_v13  ;;  %v4227_v50 = vand.u32 4294901760, %v4226_v30  ;;  %v4073_v62 = vmul.f32 2.0, %v7292_v13 }
 0x5c7   :  { %v7302_v51 = vand.u32 4294901760, %v4079_v21  ;;  %v4068_v25 = vpop.f32.mrf.mxu1  ;;  %v4156_v28 = vand.u32 4294901760, %v7295_v19 }
 0x5c8   :  { %v7308_v27 = vadd.f32 %v4068_v25, %v3983_v15  ;;  %v4219_v36 = vsub.f32 %v7292_v13, %v7300_v53  ;;  %v4228_v14 = vsub.f32 %v4226_v30, %v4227_v50 }
 0x5c9   :  { %v7311_v24 = vsub.f32 %v4079_v21, %v7302_v51  ;;  %v6082_v31 = vpop.f32.mrf.mxu1  ;;  %v4157_v35 = vsub.f32 %v7295_v19, %v4156_v28 }
 0x5ca   :  { %v4082_v37 = vsel %vm33_vm2, %v7308_v27, 0  ;;  %v4084_v40 = vsel %vm43_vm0, %v7308_v27, 0  ;;  %v4220_v11 = vand.u32 4294901760, %v4219_v36  ;;  %v4229_v26 = vand.u32 4294901760, %v4228_v14 }
 0x5cb   :  { %v7319_v29 = vand.u32 4294901760, %v4084_v40  ;;  %v7321_v42 = vand.u32 4294901760, %v4082_v37  ;;  %v4166_v60 = vand.u32 4294901760, %v7311_v24  ;;  %v4158_v4 = vand.u32 4294901760, %v4157_v35 }
 0x5cc   :  { %v4221_v33 = vsub.f32 %v4219_v36, %v4220_v11  ;;  %v4074_v25 = vmul.f32 2.0, %v7308_v27 }
 0x5cd   :  { %v7330_v41 = vsub.f32 %v4082_v37, %v7321_v42  ;;  %v4212_v20 = vsub.f32 %v4084_v40, %v7319_v29  ;;  %6084 = vmatpush3.msra.mxu0 %v7319_v29  ;;  %v4167_v23 = vsub.f32 %v7311_v24, %v4166_v60 }
 0x5ce   :  { %6085 = vmatprep.subr.mxu0 %v6252_v3  ;;  %v4222_v45 = vand.u32 4294901760, %v4221_v33 }
 0x5cf   :  { %6086 = vmatpush3.msra.mxu0 %v7300_v53  ;;  %v4213_v22 = vand.u32 4294901760, %v4212_v20  ;;  %v4176_v32 = vand.u32 4294901760, %v7330_v41  ;;  %v4168_v18 = vand.u32 4294901760, %v4167_v23 }
 0x5d0   :  { %6087 = vmatprep.subr.mxu0 %v6252_v3 }
 0x5d1   :  { %6088 = vmatpush3.msra.mxu0 %v7305_v7  ;;  %v4214_v38 = vsub.f32 %v4212_v20, %v4213_v22  ;;  %v4177_v12 = vsub.f32 %v7330_v41, %v4176_v32 }
 0x5d2   :  { %6090 = vmatmul.mubr.f32.vlgmr.msra.gmra.mxu0 %v4158_v4  ;;  %6113 = vmatprep.subr.mxu0 %v6252_v3 }
 0x5d3   :  { %6114 = vmatpush3.msra.mxu0 %v4212_v20  ;;  %6092 = vmatprep.mubr.msk.f32.mxu0 %vm6253_vm1, %v6252_v3  ;;  %v4215_v43 = vand.u32 4294901760, %v4214_v38  ;;  %v4178_v46 = vand.u32 4294901760, %v4177_v12 }
 0x5d4   :  { %6115 = vmatprep.subr.mxu0 %v6252_v3 }
 0x5d5   :  { %6099 = vmatpush3.msra.mxu1 %v4215_v43  ;;  %6116 = vmatpush3.msra.mxu0 %v4219_v36 }
 0x5d6   :  { %6093 = vmatmul.mubr.f32.gmra.mxu0 %v4168_v18  ;;  %6100 = vmatprep.subr.mxu1 %v6252_v3 }
 0x5d7   :  { %6117 = vmatprep.subr.mxu0 %v6252_v3  ;;  %6101 = vmatpush3.msra.mxu1 %v4222_v45 }
 0x5d8   :  { %6118 = vmatpush3.msra.mxu0 %v4226_v30  ;;  %6102 = vmatprep.subr.mxu1 %v6252_v3 }
 0x5d9   :  { %6095 = vmatprep.mubr.msk.f32.mxu0 %vm6253_vm1, %v6252_v3  ;;  %6103 = vmatpush3.msra.mxu1 %v4229_v26 }
 0x5da   :  { %6096 = vmatmul.mubr.f32.gmra.mxu0 %v4178_v46  ;;  %6105 = vmatmul.mubr.f32.vlgmr.msra.gmra.mxu1 %v7290_v16 }
 0x5db   :  { %6128 = vmatprep.subr.mxu1 %v6252_v3  ;;  %6107 = vmatprep.mubr.msk.f32.mxu1 %vm6253_vm1, %v6252_v3 }
 0x5dc   :  { %6129 = vmatpush3.msra.mxu1 %v7319_v29  ;;  %6119 = vmatprep.mubr.msk.f32.mxu0 %vm6253_vm1, %v6252_v3 }
 0x5dd   :  { %6130 = vmatprep.subr.mxu1 %v6252_v3  ;;  %6143 = vmatprep.subr.mxu0 %v6252_v3 }
 0x5de   :  { %6131 = vmatpush3.msra.mxu1 %v7300_v53  ;;  %6120 = vmatmul.mubr.f32.vlgmr.msra.gmra.mxu0 %v7295_v19 }
 0x5df   :  { %6108 = vmatmul.mubr.f32.gmra.mxu1 %v7302_v51  ;;  %6132 = vmatprep.subr.mxu1 %v6252_v3 }
 0x5e0   :  { %6144 = vmatpush3.msra.mxu0 %v4213_v22  ;;  %6133 = vmatpush3.msra.mxu1 %v7305_v7 }
 0x5e1   :  { %6145 = vmatprep.subr.mxu0 %v6252_v3  ;;  %6110 = vmatprep.mubr.msk.f32.mxu1 %vm6253_vm1, %v6252_v3 }
 0x5e2   :  { %6146 = vmatpush3.msra.mxu0 %v4220_v11  ;;  %6122 = vmatprep.mubr.msk.f32.mxu0 %vm6253_vm1, %v6252_v3 }
 0x5e3   :  { %6147 = vmatprep.subr.mxu0 %v6252_v3  ;;  %6111 = vmatmul.mubr.f32.gmra.mxu1 %v7321_v42 }
 0x5e4   :  { %6123 = vmatmul.mubr.f32.gmra.mxu0 %v7311_v24  ;;  %6134 = vmatprep.mubr.msk.f32.mxu1 %vm6253_vm1, %v6252_v3 }
 0x5e5   :  { %6148 = vmatpush3.msra.mxu0 %v4227_v50  ;;  %6125 = vmatprep.mubr.msk.f32.mxu0 %vm6253_vm1, %v6252_v3 }
 0x5e6   :  { %6158 = vmatprep.subr.mxu1 %v6252_v3  ;;  %6173 = vmatprep.subr.mxu0 %v6252_v3 }
 0x5e7   :  { %6135 = vmatmul.mubr.f32.vlgmr.msra.gmra.mxu1 %v4156_v28 }
 0x5e8   :  { %6126 = vmatmul.mubr.f32.gmra.mxu0 %v7330_v41  ;;  %6159 = vmatpush3.msra.mxu1 %v7319_v29 }
 0x5e9   :  { %6160 = vmatprep.subr.mxu1 %v6252_v3  ;;  %6137 = vmatprep.mubr.msk.f32.mxu1 %vm6253_vm1, %v6252_v3 }
 0x5ea   :  { %6161 = vmatpush3.msra.mxu1 %v7300_v53  ;;  %6149 = vmatprep.mubr.msk.f32.mxu0 %vm6253_vm1, %v6252_v3 }
 0x5eb   :  { %6162 = vmatprep.subr.mxu1 %v6252_v3  ;;  %6138 = vmatmul.mubr.f32.gmra.mxu1 %v4166_v60 }
 0x5ec   :  { %6150 = vmatmul.mubr.f32.vlgmr.msra.gmra.mxu0 %v7290_v16  ;;  %6163 = vmatpush3.msra.mxu1 %v7305_v7 }
 0x5ed   :  { %6140 = vmatprep.mubr.msk.f32.mxu1 %vm6253_vm1, %v6252_v3  ;;  %6152 = vmatprep.mubr.msk.f32.mxu0 %vm6253_vm1, %v6252_v3 }
 0x5ee   :  { %6182 = vmatprep.subr.mxu1 %v6252_v3 }
 0x5ef   :  { %6141 = vmatmul.mubr.f32.gmra.mxu1 %v4176_v32 }
 0x5f0   :  { %6153 = vmatmul.mubr.f32.gmra.mxu0 %v7302_v51  ;;  %6164 = vmatprep.mubr.msk.f32.mxu1 %vm6253_vm1, %v6252_v3 }
 0x5f1   :  { %6155 = vmatprep.mubr.msk.f32.mxu0 %vm6253_vm1, %v6252_v3 }
 0x5f3   :  { %6165 = vmatmul.mubr.f32.vlgmr.msra.gmra.mxu1 %v7290_v16 }
 0x5f4   :  { %6156 = vmatmul.mubr.f32.gmra.mxu0 %v7321_v42  ;;  %6167 = vmatprep.mubr.msk.f32.mxu1 %vm6253_vm1, %v6252_v3 }
 0x5f5   :  { %6179 = vmatprep.mubr.msk.f32.mxu0 %vm6253_vm1, %v6252_v3 }
 0x5f7   :  { %6168 = vmatmul.mubr.f32.gmra.mxu1 %v7302_v51 }
 0x5f8   :  { %6170 = vmatprep.mubr.msk.f32.mxu1 %vm6253_vm1, %v6252_v3 }
 0x5fb   :  { %6171 = vmatmul.mubr.f32.gmra.mxu1 %v7321_v42 }
 0x5fc   :  { %6188 = vmatprep.mubr.msk.f32.mxu1 %vm6253_vm1, %v6252_v3 }
 0x692   :  { %v4160_v49 = vpop.f32.mrf.mxu0 }
 0x693   :  { %v4161_v19 = vadd.f32 %v4160_v49, %v4072_v6 }
 0x694   :  { %v6091_v52 = vpop.f32.mrf.mxu0 }
 0x696   :  { %v4170_v10 = vpop.f32.mrf.mxu0 }
 0x697   :  { %v4171_v15 = vadd.f32 %v4170_v10, %v4073_v62 }
 0x698   :  { %v6094_v56 = vpop.f32.mrf.mxu0 }
 0x69a   :  { %v4180_v57 = vpop.f32.mrf.mxu0  ;;  %v4266_v58 = vpop.f32.mrf.mxu1 }
 0x69b   :  { %v4267_v53 = vadd.f32 %v4266_v58, %v4161_v19  ;;  %v4181_v36 = vadd.f32 %v4180_v57, %v4074_v25 }
 0x69c   :  { %v6097_v54 = vpop.f32.mrf.mxu0  ;;  %v6106_v9 = vpop.f32.mrf.mxu1 }
 0x69e   :  { %v4356_v59 = vpop.f32.mrf.mxu0 }
 0x69f   :  { %v4272_v34 = vpop.f32.mrf.mxu1  ;;  %v4357_v24 = vadd.f32 %v4356_v59, %v4267_v53 }
 0x6a0   :  { %v6121_v8 = vpop.f32.mrf.mxu0  ;;  %v4273_v7 = vadd.f32 %v4272_v34, %v4171_v15 }
 0x6a1   :  { %v6109_v61 = vpop.f32.mrf.mxu1 }
 0x6a3   :  { %v4278_v55 = vpop.f32.mrf.mxu1 }
 0x6a4   :  { %v4363_v63 = vpop.f32.mrf.mxu0  ;;  %v4279_v42 = vadd.f32 %v4278_v55, %v4181_v36 }
 0x6a5   :  { %v6112_v44 = vpop.f32.mrf.mxu1  ;;  %v4364_v37 = vadd.f32 %v4363_v63, %v4273_v7 }
 0x6a6   :  { %v6124_v39 = vpop.f32.mrf.mxu0 }
 0x6a7   :  { %v4446_v1 = vpop.f32.mrf.mxu1 }
 0x6a8   :  { %v4370_v2 = vpop.f32.mrf.mxu0  ;;  %v4447_v48 = vadd.f32 %v4446_v1, %v4357_v24 }
 0x6a9   :  { %v6136_v5 = vpop.f32.mrf.mxu1  ;;  %v4371_v41 = vadd.f32 %v4370_v2, %v4279_v42 }
 0x6aa   :  { %v6127_v47 = vpop.f32.mrf.mxu0 }
 0x6ab   :  { %v4454_v16 = vpop.f32.mrf.mxu1 }
 0x6ac   :  { %v4542_v0 = vpop.f32.mrf.mxu0  ;;  %v4455_v13 = vadd.f32 %v4454_v16, %v4364_v37 }
 0x6ad   :  { %v6139_v17 = vpop.f32.mrf.mxu1  ;;  %v4543_v35 = vadd.f32 %v4542_v0, %v4447_v48 }
 0x6ae   :  { %v6151_v21 = vpop.f32.mrf.mxu0 }
 0x6af   :  { %v4462_v51 = vpop.f32.mrf.mxu1 }
 0x6b0   :  { %v4548_v28 = vpop.f32.mrf.mxu0  ;;  %v4463_v27 = vadd.f32 %v4462_v51, %v4371_v41 }
 0x6b1   :  { %v6142_v31 = vpop.f32.mrf.mxu1  ;;  %v4549_v20 = vadd.f32 %v4548_v28, %v4455_v13 }
 0x6b2   :  { %v6154_v40 = vpop.f32.mrf.mxu0 }
 0x6b3   :  { %v4628_v29 = vpop.f32.mrf.mxu1 }
 0x6b4   :  { %v4554_v30 = vpop.f32.mrf.mxu0  ;;  %v4629_v22 = vadd.f32 %v4628_v29, %v4543_v35 }
 0x6b5   :  { %v6166_v60 = vpop.f32.mrf.mxu1  ;;  %v4555_v32 = vadd.f32 %v4554_v30, %v4463_v27 }
 0x6b6   :  { %v6157_v11 = vpop.f32.mrf.mxu0  ;;  %v7426_v33 = vand.u32 4294901760, %v4629_v22 }
 0x6b7   :  { %v4634_v50 = vpop.f32.mrf.mxu1 }
 0x6b8   :  { %v4635_v4 = vadd.f32 %v4634_v50, %v4549_v20  ;;  %v4770_v46 = vsub.f32 %v4629_v22, %v7426_v33 }
 0x6b9   :  { %v6169_v23 = vpop.f32.mrf.mxu1 }
 0x6ba   :  { %v7424_v38 = vand.u32 4294901760, %v4635_v4  ;;  %v4771_v58 = vand.u32 4294901760, %v4770_v46 }
 0x6bb   :  { %v4640_v43 = vpop.f32.mrf.mxu1 }
 0x6bc   :  { %v7428_v14 = vadd.f32 %v4640_v43, %v4555_v32  ;;  %v4763_v18 = vsub.f32 %v4635_v4, %v7424_v38  ;;  %v4772_v61 = vsub.f32 %v4770_v46, %v4771_v58 }
 0x6bd   :  { %v6172_v12 = vpop.f32.mrf.mxu1 }
 0x6be   :  { %v4646_v45 = vsel %vm33_vm2, %v7428_v14, 0  ;;  %v4648_v26 = vsel %vm43_vm0, %v7428_v14, 0  ;;  %v4764_v10 = vand.u32 4294901760, %v4763_v18  ;;  %v4773_v39 = vand.u32 4294901760, %v4772_v61 }
 0x6bf   :  { %v4677_v49 = vand.u32 4294901760, %v4648_v26  ;;  %v4718_v52 = vand.u32 4294901760, %v4646_v45  ;;  %v4644_v5 = vmul.f32 2.0, %v7428_v14 }
 0x6c0   :  { %v4765_v59 = vsub.f32 %v4763_v18, %v4764_v10 }
 0x6c1   :  { %v4719_v56 = vsub.f32 %v4646_v45, %v4718_v52  ;;  %v4756_v57 = vsub.f32 %v4648_v26, %v4677_v49  ;;  %6174 = vmatpush3.msra.mxu0 %v4677_v49 }
 0x6c2   :  { %6175 = vmatprep.subr.mxu0 %v6252_v3  ;;  %v4766_v44 = vand.u32 4294901760, %v4765_v59 }
 0x6c3   :  { %v4720_v54 = vand.u32 4294901760, %v4719_v56  ;;  %6176 = vmatpush3.msra.mxu0 %v7424_v38  ;;  %v4757_v9 = vand.u32 4294901760, %v4756_v57 }
 0x6c4   :  { %6177 = vmatprep.subr.mxu0 %v6252_v3 }
 0x6c5   :  { %v4721_v34 = vsub.f32 %v4719_v56, %v4720_v54  ;;  %6178 = vmatpush3.msra.mxu0 %v7426_v33  ;;  %v4758_v8 = vsub.f32 %v4756_v57, %v4757_v9 }
 0x6c6   :  { %6191 = vmatprep.subr.mxu0 %v6252_v3 }
 0x6c7   :  { %v4722_v55 = vand.u32 4294901760, %v4721_v34  ;;  %v4759_v63 = vand.u32 4294901760, %v4758_v8 }
 0x6c9   :  { %6180 = vmatmul.mubr.f32.vlgmr.msra.gmra.mxu0 %v4722_v55  ;;  %6183 = vmatpush3.msra.mxu1 %v4759_v63 }
 0x6ca   :  { %6192 = vmatpush3.msra.mxu0 %v4756_v57  ;;  %6184 = vmatprep.subr.mxu1 %v6252_v3 }
 0x6cb   :  { %6193 = vmatprep.subr.mxu0 %v6252_v3  ;;  %6185 = vmatpush3.msra.mxu1 %v4766_v44 }
 0x6cc   :  { %6194 = vmatpush3.msra.mxu0 %v4763_v18  ;;  %6186 = vmatprep.subr.mxu1 %v6252_v3 }
 0x6cd   :  { %6195 = vmatprep.subr.mxu0 %v6252_v3  ;;  %6187 = vmatpush3.msra.mxu1 %v4773_v39 }
 0x6ce   :  { %6196 = vmatpush3.msra.mxu0 %v4770_v46  ;;  %6197 = vmatprep.mubr.msk.f32.mxu0 %vm6253_vm1, %v6252_v3 }
 0x6cf   :  { %6189 = vmatmul.mubr.f32.vlgmr.msra.gmra.mxu1 %v4718_v52  ;;  %6198 = vmatmul.mubr.f32.vlgmr.msra.gmra.mxu0 %v4719_v56 }
 0x6d0   :  { %6200 = vmatprep.subr.mxu1 %v6252_v3  ;;  %6209 = vmatprep.subr.mxu0 %v6252_v3 }
 0x6d1   :  { %6201 = vmatpush3.msra.mxu1 %v4677_v49  ;;  %6210 = vmatpush3.msra.mxu0 %v4757_v9 }
 0x6d2   :  { %6202 = vmatprep.subr.mxu1 %v6252_v3  ;;  %6211 = vmatprep.subr.mxu0 %v6252_v3 }
 0x6d3   :  { %6203 = vmatpush3.msra.mxu1 %v7424_v38  ;;  %6212 = vmatpush3.msra.mxu0 %v4764_v10 }
 0x6d4   :  { %6204 = vmatprep.subr.mxu1 %v6252_v3  ;;  %6213 = vmatprep.subr.mxu0 %v6252_v3 }
 0x6d5   :  { %6205 = vmatpush3.msra.mxu1 %v7426_v33  ;;  %6206 = vmatprep.mubr.msk.f32.mxu1 %vm6253_vm1, %v6252_v3 }
 0x6d6   :  { %6214 = vmatpush3.msra.mxu0 %v4771_v58  ;;  %6215 = vmatprep.mubr.msk.f32.mxu0 %vm6253_vm1, %v6252_v3 }
 0x6d7   :  { %6207 = vmatmul.mubr.f32.vlgmr.msra.gmra.mxu1 %v4720_v54  ;;  %6216 = vmatmul.mubr.f32.vlgmr.msra.gmra.mxu0 %v4718_v52 }
 0x6d8   :  { %6218 = vmatprep.subr.mxu1 %v6252_v3  ;;  %6224 = vmatprep.mubr.msk.f32.mxu1 %vm6253_vm1, %v6252_v3 }
 0x6d9   :  { %6219 = vmatpush3.msra.mxu1 %v4677_v49 }
 0x6da   :  { %6220 = vmatprep.subr.mxu1 %v6252_v3 }
 0x6db   :  { %6221 = vmatpush3.msra.mxu1 %v7424_v38 }
 0x6dc   :  { %6222 = vmatprep.subr.mxu1 %v6252_v3 }
 0x6dd   :  { %6223 = vmatpush3.msra.mxu1 %v7426_v33 }
 0x6de   :  { %6225 = vmatmul.mubr.f32.vlgmr.msra.gmra.mxu1 %v4718_v52 }
 0x789   :  { %v4724_v1 = vpop.f32.mrf.mxu0 }
 0x78a   :  { %v4725_v16 = vadd.f32 %v4724_v1, %v4644_v5 }
 0x78b   :  { %v6181_v2 = vpop.f32.mrf.mxu0 }
 0x78f   :  { %v4810_v47 = vpop.f32.mrf.mxu1  ;;  %v4888_v6 = vpop.f32.mrf.mxu0 }
 0x790   :  { %v4811_v19 = vadd.f32 %v4810_v47, %v4725_v16 }
 0x791   :  { %v6190_v62 = vpop.f32.mrf.mxu1  ;;  %v6199_v0 = vpop.f32.mrf.mxu0 }
 0x792   :  { %v4889_v17 = vadd.f32 %v4888_v6, %v4811_v19 }
 0x797   :  { %v4964_v15 = vpop.f32.mrf.mxu1  ;;  %v5044_v21 = vpop.f32.mrf.mxu0 }
 0x798   :  { %v4965_v53 = vadd.f32 %v4964_v15, %v4889_v17 }
 0x799   :  { %v6208_v51 = vpop.f32.mrf.mxu1  ;;  %v6217_v25 = vpop.f32.mrf.mxu0 }
 0x79a   :  { %v5045_v3 = vadd.f32 %v5044_v21, %v4965_v53 }
 0x79e   :  { %v5118_v7 = vpop.f32.mrf.mxu1 }
 0x79f   :  { %v5119_v28 = vadd.f32 %v5118_v7, %v5045_v3 }
 0x7a0   :  { %v6226_v24 = vpop.f32.mrf.mxu1 }
 0x7a1   :  { %5123 = vst.msk [vmem:[#allocation2] sm:$0x1] %vm5122_vm6, %v5119_v28 }
 0x7a2   :  { %6241 = shalt.err (!%p6238_p4)
}
 0x7a3   :  { %5133 = dma.vmem_to_hbm [thread:$0]  %s5131_s12, 16, %s7471_s1, [#allocation3]  }
 0x7a4   :  { %6250 = dma.done.wait [#allocation3], 16  }
 0x7a5   :  { %6251 = vsyncadd [#allocation3], 4294967280 }
 0x7a6   :  { %5137 = vsyncpa [#allocation3], 1 }

</bundles_post_ra>
